<compile_context>
chip_gen: v5e
topology: v5e:2x2
jax: 0.10.0
libtpu: 0.0.40
codegen_flags: <defaults>
</compile_context>

<pallas_src>
import math
import functools

import jax
import jax.numpy as jnp
from jax import lax
from jax.experimental import pallas as pl
from jax.experimental.pallas import tpu as pltpu


def _vmem_capacity_bytes():
    # Physical per-core VMEM (v5e/v6e: 128 MiB, v7x: 64 MiB). Conservative fallback.
    try:
        return int(pltpu.get_tpu_info().vmem_capacity_bytes)
    except Exception:
        return 64 * 1024 * 1024


# ----------------------------------------------------------------------------
# Kernel A: coordinate-descent solver (single invocation, grid=(1,)).
#   Factors are kept TRANSPOSED, ut:(R,M), vt:(R,N), so the long dimension lives
#   in the 128-lane axis and every per-rank CD update is a lane-dense row op.
# ----------------------------------------------------------------------------
def _qmf_cd_kernel(x_hbm, ut0_hbm, vt0_hbm, w_in_ref,          # inputs
                   ut_out_hbm, vt_out_hbm, w_out_ref,          # outputs
                   x_vmem, ut_vmem, vt_vmem, sems,             # scratch
                   *, num_iters, l2, l1_ratio, eps, bounds):
    # Manual DMAs: one resident copy of x, single-buffered factors.
    cp_x = pltpu.make_async_copy(x_hbm, x_vmem, sems.at[0])
    cp_u = pltpu.make_async_copy(ut0_hbm, ut_vmem, sems.at[1])
    cp_v = pltpu.make_async_copy(vt0_hbm, vt_vmem, sems.at[2])
    cp_x.start()
    cp_u.start()
    cp_v.start()

    w_out_ref[0] = w_in_ref[0]            # w0
    w_out_ref[1] = w_in_ref[1]            # w1

    M, N = x_vmem.shape
    R = ut_vmem.shape[0]
    mn = jnp.float32(M * N)

    # Regularization constants (static Python floats; defaults all zero).
    l1_u = l2[0] * l1_ratio * N
    l1_v = l2[1] * l1_ratio * M
    l2_u = l2[0] * (1.0 - l1_ratio) * N
    l2_v = l2[1] * (1.0 - l1_ratio) * M

    def project(t):
        # QMF._project: round to integers (+ optional clamp to static bounds).
        t = jnp.round(t)
        if bounds != (None, None):
            t = jnp.clip(t, float(math.ceil(bounds[0])), float(math.floor(bounds[1])))
        return t

    def soft_thresholding(t, l1):
        if l1 == 0.0:                     # static; default l2 = 0 -> identity
            return t
        return jnp.sign(t) * jnp.maximum(jnp.abs(t) - l1, 0.0)

    def rank_sweep(fac_ref, raw, sv_other, gram, inv_w1, w0i, l1, l2r):
        # Gauss-Seidel over the rank rows of fac_ref (R, P), updated in place.
        # The affine fold a = inv_w1*raw - w0i*sv is applied per row so no second
        # (R, P) temporary is materialized next to `raw`.
        for r in range(R):                # static unroll; R is small
            acc = inv_w1 * raw[r:r + 1, :] - w0i * sv_other[r:r + 1, :]   # (1, P)
            for s in range(R):
                if s == r:
                    continue
                # Lane-dense broadcast-FMA; rows s < r already hold updated values
                # (reference semantics: u_new is updated in place in the rank loop).
                acc = acc - gram[s:s + 1, r:r + 1] * fac_ref[s:s + 1, :]
            numerator = soft_thresholding(acc, l1)
            # One scalar reciprocal per rank instead of a P-length vector divide
            # (approx=False keeps rounding identical to an exact divide).
            rcp = pl.reciprocal(gram[r:r + 1, r:r + 1] + (l2r + eps), approx=False)
            fac_ref[r:r + 1, :] = project((numerator + eps) * rcp)
        # TODO(synk): for very large M/N chunk the (1, P) row ops along the lane
        # axis (lax.fori_loop over ~2048-wide slabs) to bound vreg live ranges.

    # Overlap the big x DMA with the small work that only needs the factors.
    cp_v.wait()
    vt0 = vt_vmem[...]
    gram_v0 = lax.dot_general(vt0, vt0, (((1,), (1,)), ((), ())),
                              preferred_element_type=jnp.float32)     # (R, R) = v^T v
    sv0 = jnp.sum(vt0, axis=1, keepdims=True)                         # (R, 1)
    cp_u.wait()
    cp_x.wait()
    # TODO(synk): chunk the x copy and fold sx into per-chunk partial sums to fully
    # hide the initial DMA when num_iters is small.
    sx = jnp.sum(x_vmem[...])             # loop-invariant: hoisted out of the loop

    def iter_body(_, carry):
        # gram_v / sv are carried from the previous iteration's w-update (exactly
        # v^T v and rowsum(v) of the current v) -> one fewer (R,N)x(R,N) matmul
        # and one fewer rowsum per iteration.
        gram_v, sv = carry
        x = x_vmem[...]                   # (M, N) f32, untouched in VMEM
        w0 = w_out_ref[0]
        w1 = w_out_ref[1]
        inv_w1 = 1.0 / (w1 + eps)         # safe_divide denominator, once per iteration
        w0i = w0 * inv_w1

        # ---- u update ---------------------------------------------------------
        # raw_u = (x @ v)^T computed as vt @ x^T: contraction on both operands'
        # last (lane) axis -> the MXU's native transposed-RHS orientation (same
        # pattern as q @ k^T in flash attention); no per-iteration relayout of x.
        # TODO(synk): optionally hold x (and post-projection factors) in bf16 for
        # these matmuls; kept f32 here to match the reference numerics exactly.
        vt = vt_vmem[...]
        raw_u = lax.dot_general(vt, x, (((1,), (1,)), ((), ())),
                                preferred_element_type=jnp.float32)   # (R, M)
        rank_sweep(ut_vmem, raw_u, sv, gram_v, inv_w1, w0i, l1_u, l2_u)

        # ---- v update (uses the freshly updated u) -----------------------------
        ut = ut_vmem[...]                                             # (R, M) new u
        su = jnp.sum(ut, axis=1, keepdims=True)                       # (R, 1)
        raw_v = lax.dot_general(ut, x, (((1,), (0,)), ((), ())),
                                preferred_element_type=jnp.float32)   # (R, N) = u^T x
        gram_u = lax.dot_general(ut, ut, (((1,), (1,)), ((), ())),
                                 preferred_element_type=jnp.float32)  # (R, R) = u^T u
        rank_sweep(vt_vmem, raw_v, su, gram_u, inv_w1, w0i, l1_v, l2_v)

        # ---- w update: 2x2 normal equations via Gram identities (no z = u@v^T):
        #        sum(z)   = <rowsum(u), rowsum(v)>
        #        sum(z*z) = <u^T u, v^T v>_F
        #        sum(x*z) = <v^T, u^T x>_F     (reuses raw_v from the v update)
        vt_new = vt_vmem[...]
        sv_new = jnp.sum(vt_new, axis=1, keepdims=True)
        gram_v_new = lax.dot_general(vt_new, vt_new, (((1,), (1,)), ((), ())),
                                     preferred_element_type=jnp.float32)
        sz = jnp.sum(su * sv_new)
        szz = jnp.sum(gram_u * gram_v_new)
        sxz = jnp.sum(vt_new * raw_v)
        det = mn * szz - sz * sz
        # TODO(synk): torch.linalg.lstsq returns the min-norm solution for a singular
        # 2x2 system; here we keep the previous w (scale-relative singularity guard).
        scale = jnp.maximum(jnp.abs(mn * szz), sz * sz)
        valid = jnp.abs(det) > jnp.float32(1e-12) * jnp.maximum(scale, jnp.float32(1e-30))
        safe_det = jnp.where(valid, det, jnp.float32(1.0))
        w0n = (szz * sx - sz * sxz) / safe_det
        w1n = (mn * sxz - sz * sx) / safe_det
        w_out_ref[0] = jnp.where(valid, w0n, w0)
        w_out_ref[1] = jnp.where(valid, w1n, w1)
        return gram_v_new, sv_new

    lax.fori_loop(0, num_iters, iter_body, (gram_v0, sv0))

    # Write the final factors back to HBM (outputs live in pl.ANY; one copy each).
    cp_uo = pltpu.make_async_copy(ut_vmem, ut_out_hbm, sems.at[0])
    cp_vo = pltpu.make_async_copy(vt_vmem, vt_out_hbm, sems.at[1])
    cp_uo.start()
    cp_vo.start()
    cp_uo.wait()
    cp_vo.wait()


# ----------------------------------------------------------------------------
# Kernel B: tiled reconstruction  out = w0 + w1 * (u @ v^T)
# ----------------------------------------------------------------------------
def _qmf_recon_kernel(w_ref, ut_ref, vt_ref, out_ref, *, use_bf16):
    w0 = w_ref[0]
    w1 = w_ref[1]
    ut = ut_ref[...]                      # (R, tm)
    vt = vt_ref[...]                      # (R, tn)
    if use_bf16:
        # After projection u, v are integers (exact in bf16 for |value| <= 256),
        # so the reconstruction matmul can use the fast bf16 MXU path bit-exactly.
        ut = ut.astype(jnp.bfloat16)
        vt = vt.astype(jnp.bfloat16)
    z = lax.dot_general(ut, vt, (((0,), (0,)), ((), ())),
                        preferred_element_type=jnp.float32)   # (tm, tn) of u @ v^T
    out_ref[...] = w0 + w1 * z


def qmf_forward(x, rank, num_iters=10, bounds=(None, None), num_levels=None,
                l2=(0.0, 0.0), l1_ratio=0.0, eps=1e-16):
    """QMF.forward: SVD init (plain JAX) + Pallas coordinate-descent + tiled reconstruct."""
    x = x.astype(jnp.float32)
    M, N = x.shape
    R = min(rank, M, N)

    # --- SVDInit (plain-JAX glue; SVD has no Pallas primitive) ---
    u, s, vh = jnp.linalg.svd(x, full_matrices=False)
    u = u[:, :R]
    s = jnp.sqrt(s[:R])
    vh = vh[:R, :]
    u = u * s[None, :]
    v = vh.T * s[None, :]
    if rank > R:
        u = jnp.pad(u, ((0, 0), (0, rank - R)))
        v = jnp.pad(v, ((0, 0), (0, rank - R)))
    if num_levels:
        scale_u = (u.max() - u.min()) / num_levels
        scale_v = (v.max() - v.min()) / num_levels
    else:
        scale_u = scale_v = 1.0
    u = u / scale_u
    v = v / scale_v
    ut0 = u.T                              # (rank, M): long dim in the lane axis
    vt0 = v.T                              # (rank, N)
    w_init = jnp.stack([jnp.float32(0.0),
                        jnp.asarray(scale_u * scale_v, dtype=jnp.float32)])  # (2,)

    # --- VMEM budget: derived from the chip, not hard-coded (v7x ~51 MiB cap,
    # v5e/v6e ~102 MiB). One resident f32 copy of x + single-buffered factors.
    phys_vmem = _vmem_capacity_bytes()
    x_bytes = M * N * 4
    fac_bytes = rank * (M + N) * 4
    need = x_bytes + 2 * fac_bytes + (8 << 20)
    vmem_limit_a = int(min(int(0.8 * phys_vmem), max(32 << 20, need)))
    # TODO(synk): when x_bytes exceeds this budget, stream x from HBM in (M, tile_n)
    # column tiles (pltpu.emit_pipeline) inside the CD loop instead of one resident
    # copy (optionally in bf16, which changes numerics vs the f32 reference).

    kernel_a = functools.partial(_qmf_cd_kernel, num_iters=num_iters, l2=tuple(l2),
                                 l1_ratio=l1_ratio, eps=eps, bounds=tuple(bounds))
    ut, vt, w = pl.pallas_call(
        kernel_a,
        grid=(1,),
        in_specs=[
            pl.BlockSpec(memory_space=pl.ANY),                       # x (HBM)
            pl.BlockSpec(memory_space=pl.ANY),                       # u0^T (HBM)
            pl.BlockSpec(memory_space=pl.ANY),                       # v0^T (HBM)
            pl.BlockSpec(memory_space=pltpu.MemorySpace.SMEM),       # w init (2,)
        ],
        out_specs=(
            pl.BlockSpec(memory_space=pl.ANY),                       # u^T (HBM)
            pl.BlockSpec(memory_space=pl.ANY),                       # v^T (HBM)
            pl.BlockSpec(memory_space=pltpu.MemorySpace.SMEM),       # w (2,)
        ),
        out_shape=(
            jax.ShapeDtypeStruct((rank, M), jnp.float32),
            jax.ShapeDtypeStruct((rank, N), jnp.float32),
            jax.ShapeDtypeStruct((2,), jnp.float32),
        ),
        scratch_shapes=[
            pltpu.VMEM((M, N), jnp.float32),          # single resident copy of x
            pltpu.VMEM((rank, M), jnp.float32),       # u^T working buffer
            pltpu.VMEM((rank, N), jnp.float32),       # v^T working buffer
            pltpu.SemaphoreType.DMA((3,)),
        ],
        compiler_params=pltpu.CompilerParams(
            dimension_semantics=("arbitrary",),
            vmem_limit_bytes=vmem_limit_a),
    )(x, ut0, vt0, w_init)

    # --- tiled reconstruction: HBM-writeback bound, so use large lane-dense tiles
    # (up to ~8 MiB) to amortize the ~0.35 us per-grid-step overhead; "parallel"
    # grid uses both TensorCores on v7x.
    tn = N if N <= 2048 else 2048          # last dims multiples of 128 (or full dim)
    tm = M if M <= 1024 else 1024
    tile_bytes = tm * tn * 4
    vmem_limit_b = int(min(int(0.8 * phys_vmem),
                           max(32 << 20, 2 * tile_bytes + (8 << 20))))
    use_bf16 = (bounds != (None, None) and
                bounds[0] is not None and bounds[1] is not None and
                max(abs(math.ceil(bounds[0])), abs(math.floor(bounds[1]))) <= 256)
    kernel_b = functools.partial(_qmf_recon_kernel, use_bf16=use_bf16)
    out = pl.pallas_call(
        kernel_b,
        grid=(pl.cdiv(M, tm), pl.cdiv(N, tn)),
        in_specs=[
            pl.BlockSpec(memory_space=pltpu.MemorySpace.SMEM),       # w (2,)
            pl.BlockSpec((rank, tm), lambda i, j: (0, i)),
            pl.BlockSpec((rank, tn), lambda i, j: (0, j)),
        ],
        out_specs=pl.BlockSpec((tm, tn), lambda i, j: (i, j)),
        out_shape=jax.ShapeDtypeStruct((M, N), jnp.float32),
        compiler_params=pltpu.CompilerParams(
            dimension_semantics=("parallel", "parallel"),
            vmem_limit_bytes=vmem_limit_b),
    )(w, ut, vt)
    return out


if __name__ == "__main__":
    M, N, RANK = 16, 16, 4
    key = jax.random.PRNGKey(0)
    k1, k2, k3 = jax.random.split(key, 3)
    # Deterministic synthetic input: integer-ish low-rank matrix plus small noise,
    # so the quantized (rounded) factorization is well posed.
    ua = jnp.round(3.0 * jax.random.normal(k1, (M, RANK), dtype=jnp.float32))
    vb = jnp.round(3.0 * jax.random.normal(k2, (N, RANK), dtype=jnp.float32))
    x = ua @ vb.T + 0.1 * jax.random.normal(k3, (M, N), dtype=jnp.float32)

    out = qmf_forward(x, rank=RANK, num_iters=10)
    out = jax.block_until_ready(out)

    assert out.shape == (M, N)
    assert bool(jnp.all(jnp.isfinite(out)))
    print("KERNEL_OK")
</pallas_src>

<mosaic_0001>
module attributes {stable_mosaic.version = 11 : i64} {
  func.func @_qmf_cd_kernel(%arg0: i32, %arg1: memref<16x16xf32, #tpu.memory_space<any>>, %arg2: memref<4x16xf32, #tpu.memory_space<any>>, %arg3: memref<4x16xf32, #tpu.memory_space<any>>, %arg4: memref<2xf32, #tpu.memory_space<smem>>, %arg5: memref<4x16xf32, #tpu.memory_space<any>>, %arg6: memref<4x16xf32, #tpu.memory_space<any>>, %arg7: memref<2xf32, #tpu.memory_space<smem>>, %arg8: memref<16x16xf32, #tpu.memory_space<vmem>>, %arg9: memref<4x16xf32, #tpu.memory_space<vmem>>, %arg10: memref<4x16xf32, #tpu.memory_space<vmem>>, %arg11: memref<3x!tpu.dma_semaphore, #tpu.memory_space<semaphore_mem>>) attributes {dimension_semantics = [#tpu.dimension_semantics<arbitrary>], iteration_bounds = array<i64: 1>, scalar_prefetch = 0 : i64, scratch_operands = 4 : i64, tpu.core_type = #tpu.core_type<tc>, window_params = [{}, {}, {}, {transform_indices = @transform_3, window_bounds = array<i64: 2>}, {}, {}, {transform_indices = @transform_6, window_bounds = array<i64: 2>}]} {
    %c0_i32 = arith.constant 0 : i32
    %0 = tpu.memref_slice %arg11[%c0_i32] : memref<3x!tpu.dma_semaphore, #tpu.memory_space<semaphore_mem>> -> memref<1x!tpu.dma_semaphore, #tpu.memory_space<semaphore_mem>>
    %1 = tpu.memref_squeeze %0 : memref<1x!tpu.dma_semaphore, #tpu.memory_space<semaphore_mem>> -> memref<!tpu.dma_semaphore, #tpu.memory_space<semaphore_mem>>
    tpu.enqueue_dma source(%arg1 : memref<16x16xf32, #tpu.memory_space<any>>) target(%arg8 : memref<16x16xf32, #tpu.memory_space<vmem>>) target_semaphore(%1 : memref<!tpu.dma_semaphore, #tpu.memory_space<semaphore_mem>>)
    %c1_i32 = arith.constant 1 : i32
    %2 = tpu.memref_slice %arg11[%c1_i32] : memref<3x!tpu.dma_semaphore, #tpu.memory_space<semaphore_mem>> -> memref<1x!tpu.dma_semaphore, #tpu.memory_space<semaphore_mem>>
    %3 = tpu.memref_squeeze %2 : memref<1x!tpu.dma_semaphore, #tpu.memory_space<semaphore_mem>> -> memref<!tpu.dma_semaphore, #tpu.memory_space<semaphore_mem>>
    tpu.enqueue_dma source(%arg2 : memref<4x16xf32, #tpu.memory_space<any>>) target(%arg9 : memref<4x16xf32, #tpu.memory_space<vmem>>) target_semaphore(%3 : memref<!tpu.dma_semaphore, #tpu.memory_space<semaphore_mem>>)
    %c2_i32 = arith.constant 2 : i32
    %4 = tpu.memref_slice %arg11[%c2_i32] : memref<3x!tpu.dma_semaphore, #tpu.memory_space<semaphore_mem>> -> memref<1x!tpu.dma_semaphore, #tpu.memory_space<semaphore_mem>>
    %5 = tpu.memref_squeeze %4 : memref<1x!tpu.dma_semaphore, #tpu.memory_space<semaphore_mem>> -> memref<!tpu.dma_semaphore, #tpu.memory_space<semaphore_mem>>
    tpu.enqueue_dma source(%arg3 : memref<4x16xf32, #tpu.memory_space<any>>) target(%arg10 : memref<4x16xf32, #tpu.memory_space<vmem>>) target_semaphore(%5 : memref<!tpu.dma_semaphore, #tpu.memory_space<semaphore_mem>>)
    %c0 = arith.constant 0 : index
    %6 = memref.load %arg4[%c0] : memref<2xf32, #tpu.memory_space<smem>>
    %c0_0 = arith.constant 0 : index
    %7 = memref.load %arg7[%c0_0] : memref<2xf32, #tpu.memory_space<smem>>
    memref.store %6, %arg7[%c0_0] : memref<2xf32, #tpu.memory_space<smem>>
    %c1 = arith.constant 1 : index
    %8 = memref.load %arg4[%c1] : memref<2xf32, #tpu.memory_space<smem>>
    %c1_1 = arith.constant 1 : index
    %9 = memref.load %arg7[%c1_1] : memref<2xf32, #tpu.memory_space<smem>>
    memref.store %8, %arg7[%c1_1] : memref<2xf32, #tpu.memory_space<smem>>
    %c2_i32_2 = arith.constant 2 : i32
    %10 = tpu.memref_slice %arg11[%c2_i32_2] : memref<3x!tpu.dma_semaphore, #tpu.memory_space<semaphore_mem>> -> memref<1x!tpu.dma_semaphore, #tpu.memory_space<semaphore_mem>>
    %11 = tpu.memref_squeeze %10 : memref<1x!tpu.dma_semaphore, #tpu.memory_space<semaphore_mem>> -> memref<!tpu.dma_semaphore, #tpu.memory_space<semaphore_mem>>
    tpu.wait_dma2 semaphore(%11 : memref<!tpu.dma_semaphore, #tpu.memory_space<semaphore_mem>>) src(%arg3 : memref<4x16xf32, #tpu.memory_space<any>>) dst(%arg10 : memref<4x16xf32, #tpu.memory_space<vmem>>)
    %c0_3 = arith.constant 0 : index
    %c0_4 = arith.constant 0 : index
    %12 = vector.load %arg10[%c0_3, %c0_4] : memref<4x16xf32, #tpu.memory_space<vmem>>, vector<4x16xf32>
    %cst = arith.constant dense<0.000000e+00> : vector<4x4xf32>
    %13 = tpu.matmul %12, %12, %cst {dimension_numbers = #tpu.dot_dimension_numbers<[1], [1], [0], [0], [0, 0, 1, 0], [], []>} : vector<4x16xf32>, vector<4x16xf32>, vector<4x4xf32> -> vector<4x4xf32>
    %cst_5 = arith.constant dense<0.000000e+00> : vector<4xf32>
    %14 = vector.multi_reduction <add>, %12, %cst_5 [1] : vector<4x16xf32> to vector<4xf32>
    %15 = vector.shape_cast %14 : vector<4xf32> to vector<4x1xf32>
    %c1_i32_6 = arith.constant 1 : i32
    %16 = tpu.memref_slice %arg11[%c1_i32_6] : memref<3x!tpu.dma_semaphore, #tpu.memory_space<semaphore_mem>> -> memref<1x!tpu.dma_semaphore, #tpu.memory_space<semaphore_mem>>
    %17 = tpu.memref_squeeze %16 : memref<1x!tpu.dma_semaphore, #tpu.memory_space<semaphore_mem>> -> memref<!tpu.dma_semaphore, #tpu.memory_space<semaphore_mem>>
    tpu.wait_dma2 semaphore(%17 : memref<!tpu.dma_semaphore, #tpu.memory_space<semaphore_mem>>) src(%arg2 : memref<4x16xf32, #tpu.memory_space<any>>) dst(%arg9 : memref<4x16xf32, #tpu.memory_space<vmem>>)
    %c0_i32_7 = arith.constant 0 : i32
    %18 = tpu.memref_slice %arg11[%c0_i32_7] : memref<3x!tpu.dma_semaphore, #tpu.memory_space<semaphore_mem>> -> memref<1x!tpu.dma_semaphore, #tpu.memory_space<semaphore_mem>>
    %19 = tpu.memref_squeeze %18 : memref<1x!tpu.dma_semaphore, #tpu.memory_space<semaphore_mem>> -> memref<!tpu.dma_semaphore, #tpu.memory_space<semaphore_mem>>
    tpu.wait_dma2 semaphore(%19 : memref<!tpu.dma_semaphore, #tpu.memory_space<semaphore_mem>>) src(%arg1 : memref<16x16xf32, #tpu.memory_space<any>>) dst(%arg8 : memref<16x16xf32, #tpu.memory_space<vmem>>)
    %c0_8 = arith.constant 0 : index
    %c0_9 = arith.constant 0 : index
    %20 = vector.load %arg8[%c0_8, %c0_9] : memref<16x16xf32, #tpu.memory_space<vmem>>, vector<16x16xf32>
    %21 = vector.shape_cast %20 : vector<16x16xf32> to vector<1x16x16xf32>
    %cst_10 = arith.constant dense<0.000000e+00> : vector<1xf32>
    %22 = vector.multi_reduction <add>, %21, %cst_10 [1, 2] : vector<1x16x16xf32> to vector<1xf32>
    %23 = vector.shape_cast %22 : vector<1xf32> to vector<1x1x1xf32>
    %24 = vector.extract %23[0, 0, 0] : f32 from vector<1x1x1xf32>
    %cst_11 = arith.constant 2.560000e+02 : f32
    %c0_i32_12 = arith.constant 0 : i32
    %c10_i32 = arith.constant 10 : i32
    %25 = arith.addi %c0_i32_12, %c10_i32 : i32
    %c1_i32_13 = arith.constant 1 : i32
    %26:2 = scf.for %arg12 = %c0_i32_12 to %25 step %c1_i32_13 iter_args(%arg13 = %13, %arg14 = %15) -> (vector<4x4xf32>, vector<4x1xf32>)  : i32 {
      %c0_18 = arith.constant 0 : index
      %c0_19 = arith.constant 0 : index
      %35 = vector.load %arg8[%c0_18, %c0_19] : memref<16x16xf32, #tpu.memory_space<vmem>>, vector<16x16xf32>
      %c0_20 = arith.constant 0 : index
      %36 = memref.load %arg7[%c0_20] : memref<2xf32, #tpu.memory_space<smem>>
      %c1_21 = arith.constant 1 : index
      %37 = memref.load %arg7[%c1_21] : memref<2xf32, #tpu.memory_space<smem>>
      %cst_22 = arith.constant 1.000000e-16 : f32
      %38 = arith.addf %37, %cst_22 : f32
      %cst_23 = arith.constant 1.000000e+00 : f32
      %39 = arith.divf %cst_23, %38 : f32
      %40 = arith.mulf %36, %39 : f32
      %c0_24 = arith.constant 0 : index
      %c0_25 = arith.constant 0 : index
      %41 = vector.load %arg10[%c0_24, %c0_25] : memref<4x16xf32, #tpu.memory_space<vmem>>, vector<4x16xf32>
      %cst_26 = arith.constant dense<0.000000e+00> : vector<4x16xf32>
      %42 = tpu.matmul %41, %35, %cst_26 {dimension_numbers = #tpu.dot_dimension_numbers<[1], [1], [0], [0], [0, 0, 1, 0], [], []>} : vector<4x16xf32>, vector<16x16xf32>, vector<4x16xf32> -> vector<4x16xf32>
      %43 = vector.extract_strided_slice %42 {offsets = [0, 0], sizes = [1, 16], strides = [1, 1]} : vector<4x16xf32> to vector<1x16xf32>
      %44 = vector.broadcast %39 : f32 to vector<1x16xf32>
      %45 = arith.mulf %44, %43 : vector<1x16xf32>
      %46 = vector.extract_strided_slice %arg14 {offsets = [0, 0], sizes = [1, 1], strides = [1, 1]} : vector<4x1xf32> to vector<1x1xf32>
      %47 = vector.broadcast %40 : f32 to vector<1x1xf32>
      %48 = arith.mulf %47, %46 : vector<1x1xf32>
      %49 = vector.broadcast %48 : vector<1x1xf32> to vector<1x16xf32>
      %50 = arith.subf %45, %49 : vector<1x16xf32>
      %51 = vector.extract_strided_slice %arg13 {offsets = [1, 0], sizes = [1, 1], strides = [1, 1]} : vector<4x4xf32> to vector<1x1xf32>
      %c1_27 = arith.constant 1 : index
      %c0_28 = arith.constant 0 : index
      %52 = vector.load %arg9[%c1_27, %c0_28] : memref<4x16xf32, #tpu.memory_space<vmem>>, vector<1x16xf32>
      %53 = vector.broadcast %51 : vector<1x1xf32> to vector<1x16xf32>
      %54 = arith.mulf %53, %52 : vector<1x16xf32>
      %55 = arith.subf %50, %54 : vector<1x16xf32>
      %56 = vector.extract_strided_slice %arg13 {offsets = [2, 0], sizes = [1, 1], strides = [1, 1]} : vector<4x4xf32> to vector<1x1xf32>
      %c2 = arith.constant 2 : index
      %c0_29 = arith.constant 0 : index
      %57 = vector.load %arg9[%c2, %c0_29] : memref<4x16xf32, #tpu.memory_space<vmem>>, vector<1x16xf32>
      %58 = vector.broadcast %56 : vector<1x1xf32> to vector<1x16xf32>
      %59 = arith.mulf %58, %57 : vector<1x16xf32>
      %60 = arith.subf %55, %59 : vector<1x16xf32>
      %61 = vector.extract_strided_slice %arg13 {offsets = [3, 0], sizes = [1, 1], strides = [1, 1]} : vector<4x4xf32> to vector<1x1xf32>
      %c3 = arith.constant 3 : index
      %c0_30 = arith.constant 0 : index
      %62 = vector.load %arg9[%c3, %c0_30] : memref<4x16xf32, #tpu.memory_space<vmem>>, vector<1x16xf32>
      %63 = vector.broadcast %61 : vector<1x1xf32> to vector<1x16xf32>
      %64 = arith.mulf %63, %62 : vector<1x16xf32>
      %65 = arith.subf %60, %64 : vector<1x16xf32>
      %66 = vector.extract_strided_slice %arg13 {offsets = [0, 0], sizes = [1, 1], strides = [1, 1]} : vector<4x4xf32> to vector<1x1xf32>
      %cst_31 = arith.constant 1.000000e-16 : f32
      %67 = vector.broadcast %cst_31 : f32 to vector<1x1xf32>
      %68 = arith.addf %66, %67 : vector<1x1xf32>
      %69 = tpu.reciprocal %68 : vector<1x1xf32> -> vector<1x1xf32>
      %cst_32 = arith.constant 1.000000e-16 : f32
      %70 = vector.broadcast %cst_32 : f32 to vector<1x16xf32>
      %71 = arith.addf %65, %70 : vector<1x16xf32>
      %72 = vector.broadcast %69 : vector<1x1xf32> to vector<1x16xf32>
      %73 = arith.mulf %71, %72 : vector<1x16xf32>
      %74 = math.roundeven %73 : vector<1x16xf32>
      %c0_33 = arith.constant 0 : index
      %c0_34 = arith.constant 0 : index
      %75 = vector.load %arg9[%c0_33, %c0_34] : memref<4x16xf32, #tpu.memory_space<vmem>>, vector<1x16xf32>
      tpu.vector_store %arg9[%c0_33, %c0_34], %74 {strides = array<i32>} : memref<4x16xf32, #tpu.memory_space<vmem>>, vector<1x16xf32>,
      %76 = vector.extract_strided_slice %42 {offsets = [1, 0], sizes = [1, 16], strides = [1, 1]} : vector<4x16xf32> to vector<1x16xf32>
      %77 = vector.broadcast %39 : f32 to vector<1x16xf32>
      %78 = arith.mulf %77, %76 : vector<1x16xf32>
      %79 = vector.extract_strided_slice %arg14 {offsets = [1, 0], sizes = [1, 1], strides = [1, 1]} : vector<4x1xf32> to vector<1x1xf32>
      %80 = vector.broadcast %40 : f32 to vector<1x1xf32>
      %81 = arith.mulf %80, %79 : vector<1x1xf32>
      %82 = vector.broadcast %81 : vector<1x1xf32> to vector<1x16xf32>
      %83 = arith.subf %78, %82 : vector<1x16xf32>
      %84 = vector.extract_strided_slice %arg13 {offsets = [0, 1], sizes = [1, 1], strides = [1, 1]} : vector<4x4xf32> to vector<1x1xf32>
      %c0_35 = arith.constant 0 : index
      %c0_36 = arith.constant 0 : index
      %85 = vector.load %arg9[%c0_35, %c0_36] : memref<4x16xf32, #tpu.memory_space<vmem>>, vector<1x16xf32>
      %86 = vector.broadcast %84 : vector<1x1xf32> to vector<1x16xf32>
      %87 = arith.mulf %86, %85 : vector<1x16xf32>
      %88 = arith.subf %83, %87 : vector<1x16xf32>
      %89 = vector.extract_strided_slice %arg13 {offsets = [2, 1], sizes = [1, 1], strides = [1, 1]} : vector<4x4xf32> to vector<1x1xf32>
      %c2_37 = arith.constant 2 : index
      %c0_38 = arith.constant 0 : index
      %90 = vector.load %arg9[%c2_37, %c0_38] : memref<4x16xf32, #tpu.memory_space<vmem>>, vector<1x16xf32>
      %91 = vector.broadcast %89 : vector<1x1xf32> to vector<1x16xf32>
      %92 = arith.mulf %91, %90 : vector<1x16xf32>
      %93 = arith.subf %88, %92 : vector<1x16xf32>
      %94 = vector.extract_strided_slice %arg13 {offsets = [3, 1], sizes = [1, 1], strides = [1, 1]} : vector<4x4xf32> to vector<1x1xf32>
      %c3_39 = arith.constant 3 : index
      %c0_40 = arith.constant 0 : index
      %95 = vector.load %arg9[%c3_39, %c0_40] : memref<4x16xf32, #tpu.memory_space<vmem>>, vector<1x16xf32>
      %96 = vector.broadcast %94 : vector<1x1xf32> to vector<1x16xf32>
      %97 = arith.mulf %96, %95 : vector<1x16xf32>
      %98 = arith.subf %93, %97 : vector<1x16xf32>
      %99 = vector.extract_strided_slice %arg13 {offsets = [1, 1], sizes = [1, 1], strides = [1, 1]} : vector<4x4xf32> to vector<1x1xf32>
      %cst_41 = arith.constant 1.000000e-16 : f32
      %100 = vector.broadcast %cst_41 : f32 to vector<1x1xf32>
      %101 = arith.addf %99, %100 : vector<1x1xf32>
      %102 = tpu.reciprocal %101 : vector<1x1xf32> -> vector<1x1xf32>
      %cst_42 = arith.constant 1.000000e-16 : f32
      %103 = vector.broadcast %cst_42 : f32 to vector<1x16xf32>
      %104 = arith.addf %98, %103 : vector<1x16xf32>
      %105 = vector.broadcast %102 : vector<1x1xf32> to vector<1x16xf32>
      %106 = arith.mulf %104, %105 : vector<1x16xf32>
      %107 = math.roundeven %106 : vector<1x16xf32>
      %c1_43 = arith.constant 1 : index
      %c0_44 = arith.constant 0 : index
      %108 = vector.load %arg9[%c1_43, %c0_44] : memref<4x16xf32, #tpu.memory_space<vmem>>, vector<1x16xf32>
      tpu.vector_store %arg9[%c1_43, %c0_44], %107 {strides = array<i32>} : memref<4x16xf32, #tpu.memory_space<vmem>>, vector<1x16xf32>,
      %109 = vector.extract_strided_slice %42 {offsets = [2, 0], sizes = [1, 16], strides = [1, 1]} : vector<4x16xf32> to vector<1x16xf32>
      %110 = vector.broadcast %39 : f32 to vector<1x16xf32>
      %111 = arith.mulf %110, %109 : vector<1x16xf32>
      %112 = vector.extract_strided_slice %arg14 {offsets = [2, 0], sizes = [1, 1], strides = [1, 1]} : vector<4x1xf32> to vector<1x1xf32>
      %113 = vector.broadcast %40 : f32 to vector<1x1xf32>
      %114 = arith.mulf %113, %112 : vector<1x1xf32>
      %115 = vector.broadcast %114 : vector<1x1xf32> to vector<1x16xf32>
      %116 = arith.subf %111, %115 : vector<1x16xf32>
      %117 = vector.extract_strided_slice %arg13 {offsets = [0, 2], sizes = [1, 1], strides = [1, 1]} : vector<4x4xf32> to vector<1x1xf32>
      %c0_45 = arith.constant 0 : index
      %c0_46 = arith.constant 0 : index
      %118 = vector.load %arg9[%c0_45, %c0_46] : memref<4x16xf32, #tpu.memory_space<vmem>>, vector<1x16xf32>
      %119 = vector.broadcast %117 : vector<1x1xf32> to vector<1x16xf32>
      %120 = arith.mulf %119, %118 : vector<1x16xf32>
      %121 = arith.subf %116, %120 : vector<1x16xf32>
      %122 = vector.extract_strided_slice %arg13 {offsets = [1, 2], sizes = [1, 1], strides = [1, 1]} : vector<4x4xf32> to vector<1x1xf32>
      %c1_47 = arith.constant 1 : index
      %c0_48 = arith.constant 0 : index
      %123 = vector.load %arg9[%c1_47, %c0_48] : memref<4x16xf32, #tpu.memory_space<vmem>>, vector<1x16xf32>
      %124 = vector.broadcast %122 : vector<1x1xf32> to vector<1x16xf32>
      %125 = arith.mulf %124, %123 : vector<1x16xf32>
      %126 = arith.subf %121, %125 : vector<1x16xf32>
      %127 = vector.extract_strided_slice %arg13 {offsets = [3, 2], sizes = [1, 1], strides = [1, 1]} : vector<4x4xf32> to vector<1x1xf32>
      %c3_49 = arith.constant 3 : index
      %c0_50 = arith.constant 0 : index
      %128 = vector.load %arg9[%c3_49, %c0_50] : memref<4x16xf32, #tpu.memory_space<vmem>>, vector<1x16xf32>
      %129 = vector.broadcast %127 : vector<1x1xf32> to vector<1x16xf32>
      %130 = arith.mulf %129, %128 : vector<1x16xf32>
      %131 = arith.subf %126, %130 : vector<1x16xf32>
      %132 = vector.extract_strided_slice %arg13 {offsets = [2, 2], sizes = [1, 1], strides = [1, 1]} : vector<4x4xf32> to vector<1x1xf32>
      %cst_51 = arith.constant 1.000000e-16 : f32
      %133 = vector.broadcast %cst_51 : f32 to vector<1x1xf32>
      %134 = arith.addf %132, %133 : vector<1x1xf32>
      %135 = tpu.reciprocal %134 : vector<1x1xf32> -> vector<1x1xf32>
      %cst_52 = arith.constant 1.000000e-16 : f32
      %136 = vector.broadcast %cst_52 : f32 to vector<1x16xf32>
      %137 = arith.addf %131, %136 : vector<1x16xf32>
      %138 = vector.broadcast %135 : vector<1x1xf32> to vector<1x16xf32>
      %139 = arith.mulf %137, %138 : vector<1x16xf32>
      %140 = math.roundeven %139 : vector<1x16xf32>
      %c2_53 = arith.constant 2 : index
      %c0_54 = arith.constant 0 : index
      %141 = vector.load %arg9[%c2_53, %c0_54] : memref<4x16xf32, #tpu.memory_space<vmem>>, vector<1x16xf32>
      tpu.vector_store %arg9[%c2_53, %c0_54], %140 {strides = array<i32>} : memref<4x16xf32, #tpu.memory_space<vmem>>, vector<1x16xf32>,
      %142 = vector.extract_strided_slice %42 {offsets = [3, 0], sizes = [1, 16], strides = [1, 1]} : vector<4x16xf32> to vector<1x16xf32>
      %143 = vector.broadcast %39 : f32 to vector<1x16xf32>
      %144 = arith.mulf %143, %142 : vector<1x16xf32>
      %145 = vector.extract_strided_slice %arg14 {offsets = [3, 0], sizes = [1, 1], strides = [1, 1]} : vector<4x1xf32> to vector<1x1xf32>
      %146 = vector.broadcast %40 : f32 to vector<1x1xf32>
      %147 = arith.mulf %146, %145 : vector<1x1xf32>
      %148 = vector.broadcast %147 : vector<1x1xf32> to vector<1x16xf32>
      %149 = arith.subf %144, %148 : vector<1x16xf32>
      %150 = vector.extract_strided_slice %arg13 {offsets = [0, 3], sizes = [1, 1], strides = [1, 1]} : vector<4x4xf32> to vector<1x1xf32>
      %c0_55 = arith.constant 0 : index
      %c0_56 = arith.constant 0 : index
      %151 = vector.load %arg9[%c0_55, %c0_56] : memref<4x16xf32, #tpu.memory_space<vmem>>, vector<1x16xf32>
      %152 = vector.broadcast %150 : vector<1x1xf32> to vector<1x16xf32>
      %153 = arith.mulf %152, %151 : vector<1x16xf32>
      %154 = arith.subf %149, %153 : vector<1x16xf32>
      %155 = vector.extract_strided_slice %arg13 {offsets = [1, 3], sizes = [1, 1], strides = [1, 1]} : vector<4x4xf32> to vector<1x1xf32>
      %c1_57 = arith.constant 1 : index
      %c0_58 = arith.constant 0 : index
      %156 = vector.load %arg9[%c1_57, %c0_58] : memref<4x16xf32, #tpu.memory_space<vmem>>, vector<1x16xf32>
      %157 = vector.broadcast %155 : vector<1x1xf32> to vector<1x16xf32>
      %158 = arith.mulf %157, %156 : vector<1x16xf32>
      %159 = arith.subf %154, %158 : vector<1x16xf32>
      %160 = vector.extract_strided_slice %arg13 {offsets = [2, 3], sizes = [1, 1], strides = [1, 1]} : vector<4x4xf32> to vector<1x1xf32>
      %c2_59 = arith.constant 2 : index
      %c0_60 = arith.constant 0 : index
      %161 = vector.load %arg9[%c2_59, %c0_60] : memref<4x16xf32, #tpu.memory_space<vmem>>, vector<1x16xf32>
      %162 = vector.broadcast %160 : vector<1x1xf32> to vector<1x16xf32>
      %163 = arith.mulf %162, %161 : vector<1x16xf32>
      %164 = arith.subf %159, %163 : vector<1x16xf32>
      %165 = vector.extract_strided_slice %arg13 {offsets = [3, 3], sizes = [1, 1], strides = [1, 1]} : vector<4x4xf32> to vector<1x1xf32>
      %cst_61 = arith.constant 1.000000e-16 : f32
      %166 = vector.broadcast %cst_61 : f32 to vector<1x1xf32>
      %167 = arith.addf %165, %166 : vector<1x1xf32>
      %168 = tpu.reciprocal %167 : vector<1x1xf32> -> vector<1x1xf32>
      %cst_62 = arith.constant 1.000000e-16 : f32
      %169 = vector.broadcast %cst_62 : f32 to vector<1x16xf32>
      %170 = arith.addf %164, %169 : vector<1x16xf32>
      %171 = vector.broadcast %168 : vector<1x1xf32> to vector<1x16xf32>
      %172 = arith.mulf %170, %171 : vector<1x16xf32>
      %173 = math.roundeven %172 : vector<1x16xf32>
      %c3_63 = arith.constant 3 : index
      %c0_64 = arith.constant 0 : index
      %174 = vector.load %arg9[%c3_63, %c0_64] : memref<4x16xf32, #tpu.memory_space<vmem>>, vector<1x16xf32>
      tpu.vector_store %arg9[%c3_63, %c0_64], %173 {strides = array<i32>} : memref<4x16xf32, #tpu.memory_space<vmem>>, vector<1x16xf32>,
      %c0_65 = arith.constant 0 : index
      %c0_66 = arith.constant 0 : index
      %175 = vector.load %arg9[%c0_65, %c0_66] : memref<4x16xf32, #tpu.memory_space<vmem>>, vector<4x16xf32>
      %cst_67 = arith.constant dense<0.000000e+00> : vector<4xf32>
      %176 = vector.multi_reduction <add>, %175, %cst_67 [1] : vector<4x16xf32> to vector<4xf32>
      %177 = vector.shape_cast %176 : vector<4xf32> to vector<4x1xf32>
      %cst_68 = arith.constant dense<0.000000e+00> : vector<4x16xf32>
      %178 = tpu.matmul %175, %35, %cst_68 {dimension_numbers = #tpu.dot_dimension_numbers<[1], [0], [0], [1], [0, 0, 1, 1], [], []>} : vector<4x16xf32>, vector<16x16xf32>, vector<4x16xf32> -> vector<4x16xf32>
      %cst_69 = arith.constant dense<0.000000e+00> : vector<4x4xf32>
      %179 = tpu.matmul %175, %175, %cst_69 {dimension_numbers = #tpu.dot_dimension_numbers<[1], [1], [0], [0], [0, 0, 1, 0], [], []>} : vector<4x16xf32>, vector<4x16xf32>, vector<4x4xf32> -> vector<4x4xf32>
      %180 = vector.extract_strided_slice %178 {offsets = [0, 0], sizes = [1, 16], strides = [1, 1]} : vector<4x16xf32> to vector<1x16xf32>
      %181 = vector.broadcast %39 : f32 to vector<1x16xf32>
      %182 = arith.mulf %181, %180 : vector<1x16xf32>
      %183 = vector.extract_strided_slice %177 {offsets = [0, 0], sizes = [1, 1], strides = [1, 1]} : vector<4x1xf32> to vector<1x1xf32>
      %184 = vector.broadcast %40 : f32 to vector<1x1xf32>
      %185 = arith.mulf %184, %183 : vector<1x1xf32>
      %186 = vector.broadcast %185 : vector<1x1xf32> to vector<1x16xf32>
      %187 = arith.subf %182, %186 : vector<1x16xf32>
      %188 = vector.extract_strided_slice %179 {offsets = [1, 0], sizes = [1, 1], strides = [1, 1]} : vector<4x4xf32> to vector<1x1xf32>
      %c1_70 = arith.constant 1 : index
      %c0_71 = arith.constant 0 : index
      %189 = vector.load %arg10[%c1_70, %c0_71] : memref<4x16xf32, #tpu.memory_space<vmem>>, vector<1x16xf32>
      %190 = vector.broadcast %188 : vector<1x1xf32> to vector<1x16xf32>
      %191 = arith.mulf %190, %189 : vector<1x16xf32>
      %192 = arith.subf %187, %191 : vector<1x16xf32>
      %193 = vector.extract_strided_slice %179 {offsets = [2, 0], sizes = [1, 1], strides = [1, 1]} : vector<4x4xf32> to vector<1x1xf32>
      %c2_72 = arith.constant 2 : index
      %c0_73 = arith.constant 0 : index
      %194 = vector.load %arg10[%c2_72, %c0_73] : memref<4x16xf32, #tpu.memory_space<vmem>>, vector<1x16xf32>
      %195 = vector.broadcast %193 : vector<1x1xf32> to vector<1x16xf32>
      %196 = arith.mulf %195, %194 : vector<1x16xf32>
      %197 = arith.subf %192, %196 : vector<1x16xf32>
      %198 = vector.extract_strided_slice %179 {offsets = [3, 0], sizes = [1, 1], strides = [1, 1]} : vector<4x4xf32> to vector<1x1xf32>
      %c3_74 = arith.constant 3 : index
      %c0_75 = arith.constant 0 : index
      %199 = vector.load %arg10[%c3_74, %c0_75] : memref<4x16xf32, #tpu.memory_space<vmem>>, vector<1x16xf32>
      %200 = vector.broadcast %198 : vector<1x1xf32> to vector<1x16xf32>
      %201 = arith.mulf %200, %199 : vector<1x16xf32>
      %202 = arith.subf %197, %201 : vector<1x16xf32>
      %203 = vector.extract_strided_slice %179 {offsets = [0, 0], sizes = [1, 1], strides = [1, 1]} : vector<4x4xf32> to vector<1x1xf32>
      %cst_76 = arith.constant 1.000000e-16 : f32
      %204 = vector.broadcast %cst_76 : f32 to vector<1x1xf32>
      %205 = arith.addf %203, %204 : vector<1x1xf32>
      %206 = tpu.reciprocal %205 : vector<1x1xf32> -> vector<1x1xf32>
      %cst_77 = arith.constant 1.000000e-16 : f32
      %207 = vector.broadcast %cst_77 : f32 to vector<1x16xf32>
      %208 = arith.addf %202, %207 : vector<1x16xf32>
      %209 = vector.broadcast %206 : vector<1x1xf32> to vector<1x16xf32>
      %210 = arith.mulf %208, %209 : vector<1x16xf32>
      %211 = math.roundeven %210 : vector<1x16xf32>
      %c0_78 = arith.constant 0 : index
      %c0_79 = arith.constant 0 : index
      %212 = vector.load %arg10[%c0_78, %c0_79] : memref<4x16xf32, #tpu.memory_space<vmem>>, vector<1x16xf32>
      tpu.vector_store %arg10[%c0_78, %c0_79], %211 {strides = array<i32>} : memref<4x16xf32, #tpu.memory_space<vmem>>, vector<1x16xf32>,
      %213 = vector.extract_strided_slice %178 {offsets = [1, 0], sizes = [1, 16], strides = [1, 1]} : vector<4x16xf32> to vector<1x16xf32>
      %214 = vector.broadcast %39 : f32 to vector<1x16xf32>
      %215 = arith.mulf %214, %213 : vector<1x16xf32>
      %216 = vector.extract_strided_slice %177 {offsets = [1, 0], sizes = [1, 1], strides = [1, 1]} : vector<4x1xf32> to vector<1x1xf32>
      %217 = vector.broadcast %40 : f32 to vector<1x1xf32>
      %218 = arith.mulf %217, %216 : vector<1x1xf32>
      %219 = vector.broadcast %218 : vector<1x1xf32> to vector<1x16xf32>
      %220 = arith.subf %215, %219 : vector<1x16xf32>
      %221 = vector.extract_strided_slice %179 {offsets = [0, 1], sizes = [1, 1], strides = [1, 1]} : vector<4x4xf32> to vector<1x1xf32>
      %c0_80 = arith.constant 0 : index
      %c0_81 = arith.constant 0 : index
      %222 = vector.load %arg10[%c0_80, %c0_81] : memref<4x16xf32, #tpu.memory_space<vmem>>, vector<1x16xf32>
      %223 = vector.broadcast %221 : vector<1x1xf32> to vector<1x16xf32>
      %224 = arith.mulf %223, %222 : vector<1x16xf32>
      %225 = arith.subf %220, %224 : vector<1x16xf32>
      %226 = vector.extract_strided_slice %179 {offsets = [2, 1], sizes = [1, 1], strides = [1, 1]} : vector<4x4xf32> to vector<1x1xf32>
      %c2_82 = arith.constant 2 : index
      %c0_83 = arith.constant 0 : index
      %227 = vector.load %arg10[%c2_82, %c0_83] : memref<4x16xf32, #tpu.memory_space<vmem>>, vector<1x16xf32>
      %228 = vector.broadcast %226 : vector<1x1xf32> to vector<1x16xf32>
      %229 = arith.mulf %228, %227 : vector<1x16xf32>
      %230 = arith.subf %225, %229 : vector<1x16xf32>
      %231 = vector.extract_strided_slice %179 {offsets = [3, 1], sizes = [1, 1], strides = [1, 1]} : vector<4x4xf32> to vector<1x1xf32>
      %c3_84 = arith.constant 3 : index
      %c0_85 = arith.constant 0 : index
      %232 = vector.load %arg10[%c3_84, %c0_85] : memref<4x16xf32, #tpu.memory_space<vmem>>, vector<1x16xf32>
      %233 = vector.broadcast %231 : vector<1x1xf32> to vector<1x16xf32>
      %234 = arith.mulf %233, %232 : vector<1x16xf32>
      %235 = arith.subf %230, %234 : vector<1x16xf32>
      %236 = vector.extract_strided_slice %179 {offsets = [1, 1], sizes = [1, 1], strides = [1, 1]} : vector<4x4xf32> to vector<1x1xf32>
      %cst_86 = arith.constant 1.000000e-16 : f32
      %237 = vector.broadcast %cst_86 : f32 to vector<1x1xf32>
      %238 = arith.addf %236, %237 : vector<1x1xf32>
      %239 = tpu.reciprocal %238 : vector<1x1xf32> -> vector<1x1xf32>
      %cst_87 = arith.constant 1.000000e-16 : f32
      %240 = vector.broadcast %cst_87 : f32 to vector<1x16xf32>
      %241 = arith.addf %235, %240 : vector<1x16xf32>
      %242 = vector.broadcast %239 : vector<1x1xf32> to vector<1x16xf32>
      %243 = arith.mulf %241, %242 : vector<1x16xf32>
      %244 = math.roundeven %243 : vector<1x16xf32>
      %c1_88 = arith.constant 1 : index
      %c0_89 = arith.constant 0 : index
      %245 = vector.load %arg10[%c1_88, %c0_89] : memref<4x16xf32, #tpu.memory_space<vmem>>, vector<1x16xf32>
      tpu.vector_store %arg10[%c1_88, %c0_89], %244 {strides = array<i32>} : memref<4x16xf32, #tpu.memory_space<vmem>>, vector<1x16xf32>,
      %246 = vector.extract_strided_slice %178 {offsets = [2, 0], sizes = [1, 16], strides = [1, 1]} : vector<4x16xf32> to vector<1x16xf32>
      %247 = vector.broadcast %39 : f32 to vector<1x16xf32>
      %248 = arith.mulf %247, %246 : vector<1x16xf32>
      %249 = vector.extract_strided_slice %177 {offsets = [2, 0], sizes = [1, 1], strides = [1, 1]} : vector<4x1xf32> to vector<1x1xf32>
      %250 = vector.broadcast %40 : f32 to vector<1x1xf32>
      %251 = arith.mulf %250, %249 : vector<1x1xf32>
      %252 = vector.broadcast %251 : vector<1x1xf32> to vector<1x16xf32>
      %253 = arith.subf %248, %252 : vector<1x16xf32>
      %254 = vector.extract_strided_slice %179 {offsets = [0, 2], sizes = [1, 1], strides = [1, 1]} : vector<4x4xf32> to vector<1x1xf32>
      %c0_90 = arith.constant 0 : index
      %c0_91 = arith.constant 0 : index
      %255 = vector.load %arg10[%c0_90, %c0_91] : memref<4x16xf32, #tpu.memory_space<vmem>>, vector<1x16xf32>
      %256 = vector.broadcast %254 : vector<1x1xf32> to vector<1x16xf32>
      %257 = arith.mulf %256, %255 : vector<1x16xf32>
      %258 = arith.subf %253, %257 : vector<1x16xf32>
      %259 = vector.extract_strided_slice %179 {offsets = [1, 2], sizes = [1, 1], strides = [1, 1]} : vector<4x4xf32> to vector<1x1xf32>
      %c1_92 = arith.constant 1 : index
      %c0_93 = arith.constant 0 : index
      %260 = vector.load %arg10[%c1_92, %c0_93] : memref<4x16xf32, #tpu.memory_space<vmem>>, vector<1x16xf32>
      %261 = vector.broadcast %259 : vector<1x1xf32> to vector<1x16xf32>
      %262 = arith.mulf %261, %260 : vector<1x16xf32>
      %263 = arith.subf %258, %262 : vector<1x16xf32>
      %264 = vector.extract_strided_slice %179 {offsets = [3, 2], sizes = [1, 1], strides = [1, 1]} : vector<4x4xf32> to vector<1x1xf32>
      %c3_94 = arith.constant 3 : index
      %c0_95 = arith.constant 0 : index
      %265 = vector.load %arg10[%c3_94, %c0_95] : memref<4x16xf32, #tpu.memory_space<vmem>>, vector<1x16xf32>
      %266 = vector.broadcast %264 : vector<1x1xf32> to vector<1x16xf32>
      %267 = arith.mulf %266, %265 : vector<1x16xf32>
      %268 = arith.subf %263, %267 : vector<1x16xf32>
      %269 = vector.extract_strided_slice %179 {offsets = [2, 2], sizes = [1, 1], strides = [1, 1]} : vector<4x4xf32> to vector<1x1xf32>
      %cst_96 = arith.constant 1.000000e-16 : f32
      %270 = vector.broadcast %cst_96 : f32 to vector<1x1xf32>
      %271 = arith.addf %269, %270 : vector<1x1xf32>
      %272 = tpu.reciprocal %271 : vector<1x1xf32> -> vector<1x1xf32>
      %cst_97 = arith.constant 1.000000e-16 : f32
      %273 = vector.broadcast %cst_97 : f32 to vector<1x16xf32>
      %274 = arith.addf %268, %273 : vector<1x16xf32>
      %275 = vector.broadcast %272 : vector<1x1xf32> to vector<1x16xf32>
      %276 = arith.mulf %274, %275 : vector<1x16xf32>
      %277 = math.roundeven %276 : vector<1x16xf32>
      %c2_98 = arith.constant 2 : index
      %c0_99 = arith.constant 0 : index
      %278 = vector.load %arg10[%c2_98, %c0_99] : memref<4x16xf32, #tpu.memory_space<vmem>>, vector<1x16xf32>
      tpu.vector_store %arg10[%c2_98, %c0_99], %277 {strides = array<i32>} : memref<4x16xf32, #tpu.memory_space<vmem>>, vector<1x16xf32>,
      %279 = vector.extract_strided_slice %178 {offsets = [3, 0], sizes = [1, 16], strides = [1, 1]} : vector<4x16xf32> to vector<1x16xf32>
      %280 = vector.broadcast %39 : f32 to vector<1x16xf32>
      %281 = arith.mulf %280, %279 : vector<1x16xf32>
      %282 = vector.extract_strided_slice %177 {offsets = [3, 0], sizes = [1, 1], strides = [1, 1]} : vector<4x1xf32> to vector<1x1xf32>
      %283 = vector.broadcast %40 : f32 to vector<1x1xf32>
      %284 = arith.mulf %283, %282 : vector<1x1xf32>
      %285 = vector.broadcast %284 : vector<1x1xf32> to vector<1x16xf32>
      %286 = arith.subf %281, %285 : vector<1x16xf32>
      %287 = vector.extract_strided_slice %179 {offsets = [0, 3], sizes = [1, 1], strides = [1, 1]} : vector<4x4xf32> to vector<1x1xf32>
      %c0_100 = arith.constant 0 : index
      %c0_101 = arith.constant 0 : index
      %288 = vector.load %arg10[%c0_100, %c0_101] : memref<4x16xf32, #tpu.memory_space<vmem>>, vector<1x16xf32>
      %289 = vector.broadcast %287 : vector<1x1xf32> to vector<1x16xf32>
      %290 = arith.mulf %289, %288 : vector<1x16xf32>
      %291 = arith.subf %286, %290 : vector<1x16xf32>
      %292 = vector.extract_strided_slice %179 {offsets = [1, 3], sizes = [1, 1], strides = [1, 1]} : vector<4x4xf32> to vector<1x1xf32>
      %c1_102 = arith.constant 1 : index
      %c0_103 = arith.constant 0 : index
      %293 = vector.load %arg10[%c1_102, %c0_103] : memref<4x16xf32, #tpu.memory_space<vmem>>, vector<1x16xf32>
      %294 = vector.broadcast %292 : vector<1x1xf32> to vector<1x16xf32>
      %295 = arith.mulf %294, %293 : vector<1x16xf32>
      %296 = arith.subf %291, %295 : vector<1x16xf32>
      %297 = vector.extract_strided_slice %179 {offsets = [2, 3], sizes = [1, 1], strides = [1, 1]} : vector<4x4xf32> to vector<1x1xf32>
      %c2_104 = arith.constant 2 : index
      %c0_105 = arith.constant 0 : index
      %298 = vector.load %arg10[%c2_104, %c0_105] : memref<4x16xf32, #tpu.memory_space<vmem>>, vector<1x16xf32>
      %299 = vector.broadcast %297 : vector<1x1xf32> to vector<1x16xf32>
      %300 = arith.mulf %299, %298 : vector<1x16xf32>
      %301 = arith.subf %296, %300 : vector<1x16xf32>
      %302 = vector.extract_strided_slice %179 {offsets = [3, 3], sizes = [1, 1], strides = [1, 1]} : vector<4x4xf32> to vector<1x1xf32>
      %cst_106 = arith.constant 1.000000e-16 : f32
      %303 = vector.broadcast %cst_106 : f32 to vector<1x1xf32>
      %304 = arith.addf %302, %303 : vector<1x1xf32>
      %305 = tpu.reciprocal %304 : vector<1x1xf32> -> vector<1x1xf32>
      %cst_107 = arith.constant 1.000000e-16 : f32
      %306 = vector.broadcast %cst_107 : f32 to vector<1x16xf32>
      %307 = arith.addf %301, %306 : vector<1x16xf32>
      %308 = vector.broadcast %305 : vector<1x1xf32> to vector<1x16xf32>
      %309 = arith.mulf %307, %308 : vector<1x16xf32>
      %310 = math.roundeven %309 : vector<1x16xf32>
      %c3_108 = arith.constant 3 : index
      %c0_109 = arith.constant 0 : index
      %311 = vector.load %arg10[%c3_108, %c0_109] : memref<4x16xf32, #tpu.memory_space<vmem>>, vector<1x16xf32>
      tpu.vector_store %arg10[%c3_108, %c0_109], %310 {strides = array<i32>} : memref<4x16xf32, #tpu.memory_space<vmem>>, vector<1x16xf32>,
      %c0_110 = arith.constant 0 : index
      %c0_111 = arith.constant 0 : index
      %312 = vector.load %arg10[%c0_110, %c0_111] : memref<4x16xf32, #tpu.memory_space<vmem>>, vector<4x16xf32>
      %cst_112 = arith.constant dense<0.000000e+00> : vector<4xf32>
      %313 = vector.multi_reduction <add>, %312, %cst_112 [1] : vector<4x16xf32> to vector<4xf32>
      %314 = vector.shape_cast %313 : vector<4xf32> to vector<4x1xf32>
      %cst_113 = arith.constant dense<0.000000e+00> : vector<4x4xf32>
      %315 = tpu.matmul %312, %312, %cst_113 {dimension_numbers = #tpu.dot_dimension_numbers<[1], [1], [0], [0], [0, 0, 1, 0], [], []>} : vector<4x16xf32>, vector<4x16xf32>, vector<4x4xf32> -> vector<4x4xf32>
      %316 = arith.mulf %177, %314 : vector<4x1xf32>
      %317 = vector.shape_cast %316 : vector<4x1xf32> to vector<1x4x1xf32>
      %cst_114 = arith.constant dense<0.000000e+00> : vector<1xf32>
      %318 = vector.multi_reduction <add>, %317, %cst_114 [1, 2] : vector<1x4x1xf32> to vector<1xf32>
      %319 = vector.shape_cast %318 : vector<1xf32> to vector<1x1x1xf32>
      %320 = vector.extract %319[0, 0, 0] : f32 from vector<1x1x1xf32>
      %321 = arith.mulf %179, %315 : vector<4x4xf32>
      %322 = vector.shape_cast %321 : vector<4x4xf32> to vector<1x4x4xf32>
      %cst_115 = arith.constant dense<0.000000e+00> : vector<1xf32>
      %323 = vector.multi_reduction <add>, %322, %cst_115 [1, 2] : vector<1x4x4xf32> to vector<1xf32>
      %324 = vector.shape_cast %323 : vector<1xf32> to vector<1x1x1xf32>
      %325 = vector.extract %324[0, 0, 0] : f32 from vector<1x1x1xf32>
      %326 = arith.mulf %312, %178 : vector<4x16xf32>
      %327 = vector.shape_cast %326 : vector<4x16xf32> to vector<1x4x16xf32>
      %cst_116 = arith.constant dense<0.000000e+00> : vector<1xf32>
      %328 = vector.multi_reduction <add>, %327, %cst_116 [1, 2] : vector<1x4x16xf32> to vector<1xf32>
      %329 = vector.shape_cast %328 : vector<1xf32> to vector<1x1x1xf32>
      %330 = vector.extract %329[0, 0, 0] : f32 from vector<1x1x1xf32>
      %331 = arith.mulf %cst_11, %325 : f32
      %332 = arith.mulf %320, %320 : f32
      %333 = arith.subf %331, %332 : f32
      %334 = arith.mulf %cst_11, %325 : f32
      %335 = math.absf %334 : f32
      %336 = arith.mulf %320, %320 : f32
      %337 = arith.maximumf %335, %336 : f32
      %338 = math.absf %333 : f32
      %cst_117 = arith.constant 1.000000e-30 : f32
      %339 = arith.maximumf %337, %cst_117 : f32
      %cst_118 = arith.constant 9.99999996E-13 : f32
      %340 = arith.mulf %cst_118, %339 : f32
      %341 = arith.cmpf ogt, %338, %340 : f32
      %cst_119 = arith.constant 1.000000e+00 : f32
      %342 = arith.select %341, %333, %cst_119 : f32
      %343 = arith.mulf %325, %24 : f32
      %344 = arith.mulf %320, %330 : f32
      %345 = arith.subf %343, %344 : f32
      %346 = arith.divf %345, %342 : f32
      %347 = arith.mulf %cst_11, %330 : f32
      %348 = arith.mulf %320, %24 : f32
      %349 = arith.subf %347, %348 : f32
      %350 = arith.divf %349, %342 : f32
      %351 = arith.select %341, %346, %36 : f32
      %c0_120 = arith.constant 0 : index
      %352 = memref.load %arg7[%c0_120] : memref<2xf32, #tpu.memory_space<smem>>
      memref.store %351, %arg7[%c0_120] : memref<2xf32, #tpu.memory_space<smem>>
      %353 = arith.select %341, %350, %37 : f32
      %c1_121 = arith.constant 1 : index
      %354 = memref.load %arg7[%c1_121] : memref<2xf32, #tpu.memory_space<smem>>
      memref.store %353, %arg7[%c1_121] : memref<2xf32, #tpu.memory_space<smem>>
      scf.yield %315, %314 : vector<4x4xf32>, vector<4x1xf32>
    }
    %c0_i32_14 = arith.constant 0 : i32
    %27 = tpu.memref_slice %arg11[%c0_i32_14] : memref<3x!tpu.dma_semaphore, #tpu.memory_space<semaphore_mem>> -> memref<1x!tpu.dma_semaphore, #tpu.memory_space<semaphore_mem>>
    %28 = tpu.memref_squeeze %27 : memref<1x!tpu.dma_semaphore, #tpu.memory_space<semaphore_mem>> -> memref<!tpu.dma_semaphore, #tpu.memory_space<semaphore_mem>>
    tpu.enqueue_dma source(%arg9 : memref<4x16xf32, #tpu.memory_space<vmem>>) target(%arg5 : memref<4x16xf32, #tpu.memory_space<any>>) target_semaphore(%28 : memref<!tpu.dma_semaphore, #tpu.memory_space<semaphore_mem>>)
    %c1_i32_15 = arith.constant 1 : i32
    %29 = tpu.memref_slice %arg11[%c1_i32_15] : memref<3x!tpu.dma_semaphore, #tpu.memory_space<semaphore_mem>> -> memref<1x!tpu.dma_semaphore, #tpu.memory_space<semaphore_mem>>
    %30 = tpu.memref_squeeze %29 : memref<1x!tpu.dma_semaphore, #tpu.memory_space<semaphore_mem>> -> memref<!tpu.dma_semaphore, #tpu.memory_space<semaphore_mem>>
    tpu.enqueue_dma source(%arg10 : memref<4x16xf32, #tpu.memory_space<vmem>>) target(%arg6 : memref<4x16xf32, #tpu.memory_space<any>>) target_semaphore(%30 : memref<!tpu.dma_semaphore, #tpu.memory_space<semaphore_mem>>)
    %c0_i32_16 = arith.constant 0 : i32
    %31 = tpu.memref_slice %arg11[%c0_i32_16] : memref<3x!tpu.dma_semaphore, #tpu.memory_space<semaphore_mem>> -> memref<1x!tpu.dma_semaphore, #tpu.memory_space<semaphore_mem>>
    %32 = tpu.memref_squeeze %31 : memref<1x!tpu.dma_semaphore, #tpu.memory_space<semaphore_mem>> -> memref<!tpu.dma_semaphore, #tpu.memory_space<semaphore_mem>>
    tpu.wait_dma2 semaphore(%32 : memref<!tpu.dma_semaphore, #tpu.memory_space<semaphore_mem>>) src(%arg9 : memref<4x16xf32, #tpu.memory_space<vmem>>) dst(%arg5 : memref<4x16xf32, #tpu.memory_space<any>>)
    %c1_i32_17 = arith.constant 1 : i32
    %33 = tpu.memref_slice %arg11[%c1_i32_17] : memref<3x!tpu.dma_semaphore, #tpu.memory_space<semaphore_mem>> -> memref<1x!tpu.dma_semaphore, #tpu.memory_space<semaphore_mem>>
    %34 = tpu.memref_squeeze %33 : memref<1x!tpu.dma_semaphore, #tpu.memory_space<semaphore_mem>> -> memref<!tpu.dma_semaphore, #tpu.memory_space<semaphore_mem>>
    tpu.wait_dma2 semaphore(%34 : memref<!tpu.dma_semaphore, #tpu.memory_space<semaphore_mem>>) src(%arg10 : memref<4x16xf32, #tpu.memory_space<vmem>>) dst(%arg6 : memref<4x16xf32, #tpu.memory_space<any>>)
    return
  }
  func.func @transform_3(%arg0: i32) -> i32 {
    %c0_i32 = arith.constant 0 : i32
    %c0_i32_0 = arith.constant 0 : i32
    return %c0_i32 : i32
  }
  func.func @transform_6(%arg0: i32) -> i32 {
    %c0_i32 = arith.constant 0 : i32
    %c0_i32_0 = arith.constant 0 : i32
    return %c0_i32 : i32
  }
}

</mosaic_0001>

<bundles_post_ra>
// kernel: tpu_custom_call.1
= control target key start
LH: loop header
LB: loop body
LE: loop exit
PB: predicated region body
PF: predicated region fallthrough
CT: control target
= control target key end

     0   :  { %12 = vsyncpa [#allocation8], 0  ;;  %s1309_s0 = inlined_call_operand.hbm [shape: f32[16,16], index: 0, kind: input, shape index: {}]   ;;  %s1310_s1 = inlined_call_operand.hbm [shape: f32[4,16], index: 1, kind: input, shape index: {}]   ;;  %s1311_s2 = inlined_call_operand.hbm [shape: f32[4,16], index: 2, kind: input, shape index: {}]   ;;  %s1312_s3 = inlined_call_operand.vmem [shape: f32[2], index: 3, kind: input, shape index: {}]   ;;  %s1313_s4 = inlined_call_operand.hbm [shape: f32[4,16], index: 4, kind: output, shape index: {0}]   ;;  %s1314_s5 = inlined_call_operand.hbm [shape: f32[4,16], index: 5, kind: output, shape index: {1}]   ;;  %s1315_s6 = inlined_call_operand.hbm [shape: f32[2], index: 6, kind: output, shape index: {2}]  }
   0x1   :  { %13 = vsyncpa [#allocation7], 0  ;;  %s19_s23 = sshll.u32 %s1312_s3, 4  ;;  %s1094_s24 = smov [#allocation6]   ;;  %s20_s23 = int_to_ptr.vmem [resolvable:$true] %s19_s23 }
   0x2   :  { %22 = dma.vmem_to_smem %s20_s23, 16, %s1094_s24, [#allocation8]  }
   0x3   :  { %1068 = dma.done.wait [#allocation8], 16  }
   0x4   :  { %1069 = vsyncadd [#allocation8], 4294967280 }
   0x5   :  { %27 = sfence }
   0x6   :  { %s35_s27 = sshll.u32 %s1309_s0, 4  ;;  %s1095_s28 = smov [#allocation2]   ;;  %s36_s27 = int_to_ptr.hbm [resolvable:$true] %s35_s27 }
   0x7   :  { %s37_s29 = sshll.u32 %s1095_s28, 4  ;;  %s49_s8 = sshll.u32 %s1310_s1, 4  ;;  %s38_s29 = int_to_ptr.vmem [resolvable:$true] %s37_s29  ;;  %s50_s8 = int_to_ptr.hbm [resolvable:$true] %s49_s8 }
   0x8   :  { %40 = dma.hbm_to_vmem [thread:$0]  %s36_s27, 256, %s38_s29, [#allocation5] }
   0x9   :  { %s1096_s3 = smov [#allocation3]   ;;  %s63_s12 = sshll.u32 %s1311_s2, 4  ;;  %s64_s12 = int_to_ptr.hbm [resolvable:$true] %s63_s12 }
   0xa   :  { %s1148_s9 = sshll.u32 %s1096_s3, 4  ;;  %s69_s0 = sld [smem:[#allocation6]]  ;;  %s52_s9 = int_to_ptr.vmem [resolvable:$true] %s1148_s9 }
   0xb   :  { %54 = dma.hbm_to_vmem [thread:$0]  %s50_s8, 64, %s52_s9, [#allocation5 + $0x1] }
   0xc   :  { %s1097_s13 = smov [#allocation4]   ;;  %s766_s1 = sld [smem:[#allocation6 + $0x1]] }
   0xd   :  { %s1156_s14 = sshll.u32 %s1097_s13, 4  ;;  %s66_s14 = int_to_ptr.vmem [resolvable:$true] %s1156_s14 }
   0xe   :  { %68 = dma.hbm_to_vmem [thread:$0]  %s64_s12, 64, %s66_s14, [#allocation5 + $0x2] }
  0x10   :  { %71 = sst [smem:[#allocation9]] %s69_s0 }
  0x12   :  { %74 = sst [smem:[#allocation9 + $0x1]] %s766_s1 }
  0x13   :  { %1070 = dma.done.wait [#allocation5 + $0x2], 64 }
  0x14   :  { %1071 = vsyncadd [#allocation5 + $0x2], 4294967232  ;;  %vm79_vm0 = vcmask 130048   ;;  %vm103_vm1 = vcmask 125952   ;;  %v78_v0 = vld [vmem:[#allocation4] sm:$0xf] }
  0x15   :  { %767 = vmatpush.xpose.msk.msra.mxu0 %vm79_vm0, %v78_v0  ;;  %v104_v1 = vsel %vm103_vm1, %v78_v0, 0.0 }
  0x16   :  { %105 = vadd.xlane.f32.xlu0 %v104_v1 }
  0x18   :  { %768 = vmatmul.msk.f32.vlgmr.msra.gmra.mxu0 %vm79_vm0, %v78_v0 }
  0x89   :  { %v106_v2 = vpop.xlane.xlu0 %105  }
  0x95   :  { %v100_v3 = vpop.f32.mrf.mxu0  }
  0x96   :  { %1072 = dma.done.wait [#allocation5 + $0x1], 64 }
  0x97   :  { %1073 = vsyncadd [#allocation5 + $0x1], 4294967232 }
  0x98   :  { %1074 = dma.done.wait [#allocation5], 256 }
  0x99   :  { %1075 = vsyncadd [#allocation5], 4294967040  ;;  %v112_v4 = vld [vmem:[#allocation2] sm:$0xff]  ;;  %v113_v5 = vld [vmem:[#allocation2 + $0x8] sm:$0xff]  ;;  %s1172_s15 = smov 0  }
  0x9a   :  { %v114_v6 = vsel %vm79_vm0, %v112_v4, 0.0  ;;  %v115_v7 = vsel %vm79_vm0, %v113_v5, 0.0 }
  0x9b   :  { %v116_v8 = vadd.f32 %v115_v7, %v114_v6 }
  0x9d   :  { %117 = vadd.xlane.f32.xlu0 %v116_v8 }
 0x110   :  { %v118_v9 = vpop.xlane.xlu0 %117 }
 0x111   :  { %v119_v10 = vrot.slane %v118_v9, 4 }
 0x113   :  { %v120_v11 = vadd.f32 %v119_v10, %v118_v9 }
 0x115   :  { %v121_v12 = vrot.slane %v120_v11, 2 }
 0x117   :  { %v122_v13 = vadd.f32 %v121_v12, %v120_v11 }
 0x119   :  { %v123_v14 = vrot.slane %v122_v13, 1 }
 0x11b   :  { %v124_v15 = vadd.f32 %v123_v14, %v122_v13 }
 0x11d   :  { %781 = vpush %v124_v15 }
 0x14e   :  { %s1166_s2 = spop %781 }
 0x14f LB: > { %v135_v16 = vld [vmem:[#allocation2 + $0x8] sm:$0xff]  ;;  %v1098_v17 = vmov 0   ;;  %s1182_s16 = sld [smem:[#allocation9 + $0x1]]  ;;  %v134_v18 = vld [vmem:[#allocation2] sm:$0xff]  ;;  %v223_v19 = vadd.f32 1e-16, %v1088_v3  ;;  %s1092_s15 = sphi %s1172_s15, %s131_s15   ;;  %v1088_v3 = vphi %v100_v3, %v1259_v3   ;;  %v1084_v2 = vphi %v106_v2, %v1255_v2  }
 0x150   : > { %770 = vmatpush.xpose.msk.msra.mxu0 %vm79_vm0, %v135_v16  ;;  %891 = vset.pattern.permute.xlu0 %v1098_v17  ;;  %v1099_v20 = vmov 1   ;;  %v1100_v21 = vmov 2   ;;  %v156_v22 = vld [vmem:[#allocation4] sm:$0xf]  ;;  %v1101_v44 = vmov 3   ;;  %s1192_s18 = sld [smem:[#allocation9]] }
 0x151   : > { %194 = vperm.xlu0 %891, %v1088_v3   ;;  %892 = vset.pattern.permute.xlu1 %v1099_v20  ;;  %904 = vrcp.f32 %v223_v19  ;;  %v235_v26 = vand.u32 2147483648, %v223_v19  ;;  %vm229_vm2 = vweird.f32 %v223_v19  ;;  %v233_v28 = vand.u32 2147483647, %v223_v19  ;;  %v191_v45 = vld [vmem:[#allocation3 + $0x1] sm:$0x1]  ;;  %s131_s15 = sadd.s32 1, %s1092_s15  }
 0x152   : > { %250 = vperm.xlu1 %892, %v1088_v3   ;;  %893 = vset.pattern.permute.xlu2 %v1100_v21  ;;  %v198_v46 = vrot.slane %v191_v45, 7  ;;  %v205_v47 = vld [vmem:[#allocation3 + $0x2] sm:$0x1]  ;;  %v214_v48 = vld [vmem:[#allocation3 + $0x3] sm:$0x1]  ;;  %vm246_vm10 = vcmask 122880  }
 0x153   : > { %287 = vperm.xlu2 %893, %v1088_v3   ;;  %380 = vmatpush.msra.mxu1 %v135_v16  ;;  %v236_v31 = vor.u32 1.1754944e-38, %v235_v26  ;;  %vm234_vm5 = vcmp.eq.f32.partialorder %v233_v28, 8.507059e+37  ;;  %v207_v51 = vrot.slane %v205_v47, 6  ;;  %v216_v53 = vrot.slane %v214_v48, 5  ;;  %v258_v13 = vld [vmem:[#allocation3 + $0x2] sm:$0x1] }
 0x154   : > { %771 = vmatpush.xpose.msk.msra.mxu0 %vm79_vm0, %v134_v18  ;;  %v267_v14 = vld [vmem:[#allocation3 + $0x3] sm:$0x1]  ;;  %v260_v15 = vrot.slane %v258_v13, 6  ;;  %vm283_vm12 = vcmask 123905   ;;  %vm320_vm14 = vcmask 124930   ;;  %p128_p1 = scmp.ge.s32.totalorder %s131_s15, 10  }
 0x155   : > { %381 = vmatpush.msra.mxu1 %v134_v18  ;;  %s138_s17 = sadd.f32 1e-16, %s1182_s16  ;;  %v269_v16 = vrot.slane %v267_v14, 5  ;;  %s1102_s7 = smov 1e-30  }
 0x157   : > { %772 = vmatmul.msk.f32.vlgmr.msra.gmra.mxu0 %vm79_vm0, %v156_v22  ;;  %v139_v23 = vstv %s138_s17  ;;  %v905_v24 = vpop.eup %904 }
 0x158   : > { %906 = vrcp.f32 %v139_v23  ;;  %v225_v25 = vmul.f32 %v905_v24, %v223_v19  ;;  %vm230_vm3 = vweird.f32 %v905_v24  ;;  %vm145_vm6 = vweird.f32 %v139_v23 }
 0x159   : > { %vm231_vm4 = vmor %vm229_vm2, %vm230_vm3  ;;  %v151_v34 = vand.u32 2147483648, %v139_v23  ;;  %v149_v37 = vand.u32 2147483647, %v139_v23  ;;  %vm357_vm2 = vcmask 125955  }
 0x15a   : > { %v226_v27 = vsub.f32 1.0, %v225_v25 }
 0x15b   : > { %v152_v40 = vor.u32 1.1754944e-38, %v151_v34  ;;  %vm150_vm9 = vcmp.eq.f32.partialorder %v149_v37, 8.507059e+37 }
 0x15c   : > { %v227_v29 = vmul.f32 %v905_v24, %v226_v27 }
 0x15e   : > { %v907_v30 = vpop.eup %906  ;;  %v228_v32 = vadd.f32 %v905_v24, %v227_v29 }
 0x15f   : > { %v141_v33 = vmul.f32 %v907_v30, %v139_v23  ;;  %vm146_vm7 = vweird.f32 %v907_v30 }
 0x160   : > { %v232_v35 = vsel %vm231_vm4, %v905_v24, %v228_v32  ;;  %vm147_vm8 = vmor %vm145_vm6, %vm146_vm7 }
 0x161   : > { %v142_v36 = vsub.f32 1.0, %v141_v33  ;;  %v237_v38 = vsel %vm234_vm5, %v236_v31, %v232_v35 }
 0x162   : > { %241 = vperm.xlu0 %891, %v237_v38   ;;  %278 = vperm.xlu1 %892, %v237_v38  }
 0x163   : > { %v143_v39 = vmul.f32 %v907_v30, %v142_v36  ;;  %315 = vperm.xlu2 %893, %v237_v38  }
 0x165   : > { %v144_v41 = vadd.f32 %v907_v30, %v143_v39 }
 0x167   : > { %v148_v42 = vsel %vm147_vm8, %v907_v30, %v144_v41 }
 0x168   : > { %v153_v43 = vsel %vm150_vm9, %v152_v40, %v148_v42  ;;  %v304_v42 = vld [vmem:[#allocation3 + $0x3] sm:$0x1] }
 0x169   : > { %783 = vpush %v153_v43  ;;  %v306_v45 = vrot.slane %v304_v42, 5 }
 0x16a   : > { %894 = vset.pattern.permute.xlu0 %v1101_v44  ;;  %895 = vset.pattern.permute.xlu1 %v1101_v44 }
 0x16b   : > { %324 = vperm.xlu0 %894, %v1088_v3   ;;  %352 = vperm.xlu1 %895, %v237_v38  }
 0x16c   : > { %902 = vset.pattern.permute.xlu2 %v1101_v44 }
 0x173   : > { %896 = vset.pattern.permute.xlu1 %v1098_v17  ;;  %897 = vset.pattern.permute.xlu0 %v1098_v17 }
 0x19a   : > { %s1194_s19 = spop %783 }
 0x19b   : > { %s155_s20 = smul.f32 %s1194_s19, %s1192_s18  ;;  %v186_v56 = vstv %s1194_s19 }
 0x19d   : > { %v1198_v50 = vstv %s155_s20 }
 0x19e   : > { %v189_v54 = vmul.f32 %v1084_v2, %v1198_v50 }
 0x1ad   : > { %v288_v40 = vpop.permute.xlu2 %287 }
 0x1c3   : > { %v195_v49 = vpop.permute.xlu0 %194 }
 0x1c4   : > { %v200_v52 = vmul.f32 %v198_v46, %v195_v49  ;;  %v209_v58 = vmul.f32 %v207_v51, %v195_v49  ;;  %v218_v60 = vmul.f32 %v216_v53, %v195_v49  ;;  %v251_v17 = vpop.permute.xlu1 %250  ;;  %v308_v49 = vmul.f32 %v306_v45, %v288_v40 }
 0x1c5   : > { %v262_v22 = vmul.f32 %v260_v15, %v251_v17  ;;  %v271_v24 = vmul.f32 %v269_v16, %v251_v17 }
 0x1c6   : > { %v202_v57 = vrot.slane %v200_v52, 1  ;;  %v211_v62 = vrot.slane %v209_v58, 2  ;;  %v220_v0 = vrot.slane %v218_v60, 3 }
 0x1c7   : > { %v264_v26 = vrot.slane %v262_v22, 1  ;;  %v273_v27 = vrot.slane %v271_v24, 2 }
 0x1d4   : > { %v183_v55 = vpop.f32.mrf.mxu0  ;;  %v242_v5 = vpop.permute.xlu0 %241 }
 0x1d5   : > { %v187_v59 = vmul.f32 %v186_v56, %v183_v55  ;;  %v279_v31 = vpop.permute.xlu1 %278 }
 0x1d7   : > { %v1205_v61 = vsub.f32 %v187_v59, %v189_v54  ;;  %v310_v54 = vrot.slane %v308_v49, 1  ;;  %v316_v59 = vpop.permute.xlu2 %315 }
 0x1d9   : > { %v204_v63 = vsub.f32 %v1205_v61, %v202_v57 }
 0x1db   : > { %v213_v1 = vsub.f32 %v204_v63, %v211_v62 }
 0x1dd   : > { %v222_v3 = vsub.f32 %v213_v1, %v220_v0  ;;  %v353_v22 = vpop.permute.xlu1 %352 }
 0x1df   : > { %v238_v4 = vadd.f32 1e-16, %v222_v3 }
 0x1e1   : > { %v244_v6 = vmul.f32 %v242_v5, %v238_v4 }
 0x1e3   : > { %v787_v7 = vcvt.f32.s32 %v244_v6  ;;  %v785_v8 = vand.u32 2147483647, %v244_v6  ;;  %v790_v10 = vand.u32 2147483648, %v244_v6 }
 0x1e5   : > { %v788_v2 = vcvt.s32.f32 %v787_v7  ;;  %vm786_vm11 = vcmp.lt.f32.partialorder %v785_v8, 8388608.0 }
 0x1e7   : > { %v789_v9 = vand.u32 2147483647, %v788_v2 }
 0x1e9   : > { %v791_v11 = vor.u32 %v790_v10, %v789_v9 }
 0x1eb   : > { %v792_v12 = vsel %vm786_vm11, %v791_v11, %v244_v6  ;;  %v325_v6 = vpop.permute.xlu0 %324 }
 0x1ec   : > { %247 = vst.msk [vmem:[#allocation3] sm:$0x1] %vm246_vm10, %v792_v12 }
 0x1f3   : > { %v248_v18 = vld [vmem:[#allocation3] sm:$0x1] }
 0x1f4   : > { %v253_v19 = vmul.f32 %v251_v17, %v248_v18  ;;  %v285_v41 = vld [vmem:[#allocation3] sm:$0x1] }
 0x1f5   : > { %v290_v43 = vmul.f32 %v288_v40, %v285_v41  ;;  %v322_v7 = vld [vmem:[#allocation3] sm:$0x1] }
 0x1f6   : > { %v255_v23 = vrot.slane %v253_v19, 7  ;;  %v327_v9 = vmul.f32 %v325_v6, %v322_v7 }
 0x1f7   : > { %v292_v47 = vrot.slane %v290_v43, 6 }
 0x1f8   : > { %v257_v25 = vsub.f32 %v1205_v61, %v255_v23  ;;  %v329_v11 = vrot.slane %v327_v9, 5 }
 0x1f9   : > { %v294_v52 = vsub.f32 %v1205_v61, %v292_v47 }
 0x1fa   : > { %v266_v28 = vsub.f32 %v257_v25, %v264_v26  ;;  %v331_v15 = vsub.f32 %v1205_v61, %v329_v11  ;;  %v475_v11 = vld [vmem:[#allocation4 + $0x2] sm:$0x1] }
 0x1fc   : > { %v275_v29 = vsub.f32 %v266_v28, %v273_v27 }
 0x1fe   : > { %v276_v30 = vadd.f32 1e-16, %v275_v29 }
 0x200   : > { %v281_v32 = vmul.f32 %v279_v31, %v276_v30 }
 0x202   : > { %v795_v33 = vcvt.f32.s32 %v281_v32  ;;  %v793_v35 = vand.u32 2147483647, %v281_v32  ;;  %v798_v37 = vand.u32 2147483648, %v281_v32 }
 0x204   : > { %v796_v34 = vcvt.s32.f32 %v795_v33  ;;  %vm794_vm13 = vcmp.lt.f32.partialorder %v793_v35, 8388608.0 }
 0x206   : > { %v797_v36 = vand.u32 2147483647, %v796_v34 }
 0x208   : > { %v799_v38 = vor.u32 %v798_v37, %v797_v36 }
 0x20a   : > { %v800_v39 = vsel %vm794_vm13, %v799_v38, %v281_v32  ;;  %vm613_vm13 = vcmask 27648  }
 0x20b   : > { %284 = vst.msk [vmem:[#allocation3] sm:$0x2] %vm283_vm12, %v800_v39 }
 0x212   : > { %v295_v46 = vld [vmem:[#allocation3 + $0x1] sm:$0x1] }
 0x213   : > { %v297_v48 = vrot.slane %v295_v46, 7  ;;  %v332_v4 = vld [vmem:[#allocation3 + $0x1] sm:$0x1] }
 0x214   : > { %v334_v8 = vrot.slane %v332_v4, 7 }
 0x215   : > { %v299_v51 = vmul.f32 %v297_v48, %v288_v40  ;;  %v423_v48 = vld [vmem:[#allocation4 + $0x2] sm:$0x1] }
 0x216   : > { %v336_v10 = vmul.f32 %v334_v8, %v325_v6 }
 0x217   : > { %v301_v53 = vrot.slane %v299_v51, 7 }
 0x218   : > { %v338_v13 = vrot.slane %v336_v10, 6 }
 0x219   : > { %v303_v55 = vsub.f32 %v294_v52, %v301_v53  ;;  %v432_v53 = vld [vmem:[#allocation4 + $0x3] sm:$0x1] }
 0x21a   : > { %v340_v17 = vsub.f32 %v331_v15, %v338_v13  ;;  %v477_v13 = vrot.slane %v475_v11, 6 }
 0x21b   : > { %v312_v57 = vsub.f32 %v303_v55, %v310_v54 }
 0x21d   : > { %v313_v58 = vadd.f32 1e-16, %v312_v57 }
 0x21f   : > { %v318_v60 = vmul.f32 %v316_v59, %v313_v58  ;;  %v434_v58 = vrot.slane %v432_v53, 5 }
 0x221   : > { %v803_v62 = vcvt.f32.s32 %v318_v60  ;;  %v801_v0 = vand.u32 2147483647, %v318_v60  ;;  %v806_v3 = vand.u32 2147483648, %v318_v60 }
 0x223   : > { %v804_v63 = vcvt.s32.f32 %v803_v62  ;;  %vm802_vm15 = vcmp.lt.f32.partialorder %v801_v0, 8388608.0 }
 0x225   : > { %v805_v1 = vand.u32 2147483647, %v804_v63 }
 0x227   : > { %v807_v5 = vor.u32 %v806_v3, %v805_v1 }
 0x229   : > { %v808_v2 = vsel %vm802_vm15, %v807_v5, %v318_v60 }
 0x22a   : > { %321 = vst.msk [vmem:[#allocation3] sm:$0x4] %vm320_vm14, %v808_v2 }
 0x231   : > { %v341_v12 = vld [vmem:[#allocation3 + $0x2] sm:$0x1] }
 0x232   : > { %v343_v14 = vrot.slane %v341_v12, 6  ;;  %v484_v12 = vld [vmem:[#allocation4 + $0x3] sm:$0x1] }
 0x233   : > { %v486_v15 = vrot.slane %v484_v12, 5 }
 0x234   : > { %v345_v16 = vmul.f32 %v343_v14, %v325_v6 }
 0x236   : > { %v347_v18 = vrot.slane %v345_v16, 7 }
 0x238   : > { %v349_v19 = vsub.f32 %v340_v17, %v347_v18 }
 0x23a   : > { %v350_v23 = vadd.f32 1e-16, %v349_v19 }
 0x23c   : > { %v355_v24 = vmul.f32 %v353_v22, %v350_v23 }
 0x23e   : > { %v811_v25 = vcvt.f32.s32 %v355_v24  ;;  %v809_v27 = vand.u32 2147483647, %v355_v24  ;;  %v814_v29 = vand.u32 2147483648, %v355_v24 }
 0x240   : > { %v812_v26 = vcvt.s32.f32 %v811_v25  ;;  %vm810_vm3 = vcmp.lt.f32.partialorder %v809_v27, 8388608.0 }
 0x242   : > { %v813_v28 = vand.u32 2147483647, %v812_v26 }
 0x244   : > { %v815_v30 = vor.u32 %v814_v29, %v813_v28 }
 0x246   : > { %v816_v31 = vsel %vm810_vm3, %v815_v30, %v355_v24 }
 0x247   : > { %358 = vst.msk [vmem:[#allocation3] sm:$0x8] %vm357_vm2, %v816_v31 }
 0x24e   : > { %v359_v32 = vld [vmem:[#allocation3] sm:$0xf] }
 0x24f   : > { %773 = vmatmul.msk.f32.vlgmr.msra.gmra.mxu1 %vm79_vm0, %v359_v32  ;;  %774 = vmatpush.xpose.msk.msra.mxu2 %vm79_vm0, %v359_v32  ;;  %v360_v61 = vsel %vm103_vm1, %v359_v32, 0.0 }
 0x250   : > { %361 = vadd.xlane.f32.xlu2 %v360_v61 }
 0x252   : > { %775 = vmatmul.msk.f32.vlgmr.msra.gmra.mxu2 %vm79_vm0, %v359_v32 }
 0x2c3   : > { %v1233_v49 = vpop.xlane.xlu2 %361 }
 0x2c4   : > { %v407_v55 = vmul.f32 %v1233_v49, %v1198_v50 }
 0x2cc   : > { %v1231_v46 = vpop.f32.mrf.mxu1 }
 0x2cd   : > { %v406_v51 = vmul.f32 %v1231_v46, %v186_v56 }
 0x2cf   : > { %v1240_v57 = vsub.f32 %v406_v51, %v407_v55 }
 0x2d5   : > { %v1219_v33 = vpop.f32.mrf.mxu2 }
 0x2d6   : > { %v441_v34 = vadd.f32 1e-16, %v1219_v33  ;;  %412 = vperm.xlu1 %896, %v1219_v33  }
 0x2d8   : > { %908 = vrcp.f32 %v441_v34  ;;  %v453_v38 = vand.u32 2147483648, %v441_v34  ;;  %v451_v40 = vand.u32 2147483647, %v441_v34  ;;  %vm447_vm5 = vweird.f32 %v441_v34 }
 0x2da   : > { %v454_v42 = vor.u32 1.1754944e-38, %v453_v38  ;;  %vm452_vm7 = vcmp.eq.f32.partialorder %v451_v40, 8.507059e+37 }
 0x2de   : > { %v909_v35 = vpop.eup %908  ;;  %898 = vset.pattern.permute.xlu1 %v1099_v20  ;;  %v409_v20 = vld [vmem:[#allocation4 + $0x1] sm:$0x1] }
 0x2df   : > { %467 = vperm.xlu1 %898, %v1219_v33   ;;  %v443_v36 = vmul.f32 %v909_v35, %v441_v34  ;;  %vm448_vm4 = vweird.f32 %v909_v35  ;;  %v416_v47 = vrot.slane %v409_v20, 7 }
 0x2e0   : > { %vm449_vm6 = vmor %vm447_vm5, %vm448_vm4 }
 0x2e1   : > { %v444_v37 = vsub.f32 1.0, %v443_v36 }
 0x2e3   : > { %v445_v39 = vmul.f32 %v909_v35, %v444_v37 }
 0x2e5   : > { %v446_v41 = vadd.f32 %v909_v35, %v445_v39  ;;  %v520_v39 = vld [vmem:[#allocation4 + $0x3] sm:$0x1] }
 0x2e7   : > { %v450_v43 = vsel %vm449_vm6, %v909_v35, %v446_v41 }
 0x2e8   : > { %v455_v45 = vsel %vm452_vm7, %v454_v42, %v450_v43  ;;  %v522_v42 = vrot.slane %v520_v39, 5 }
 0x2e9   : > { %495 = vperm.xlu1 %898, %v455_v45   ;;  %459 = vperm.xlu0 %897, %v455_v45  }
 0x2ea   : > { %567 = vperm.xlu2 %902, %v455_v45  }
 0x2f1   : > { %900 = vset.pattern.permute.xlu1 %v1100_v21  ;;  %899 = vset.pattern.permute.xlu0 %v1100_v21  ;;  %v425_v21 = vrot.slane %v423_v48, 6 }
 0x2f2   : > { %531 = vperm.xlu1 %900, %v455_v45   ;;  %503 = vperm.xlu0 %899, %v1219_v33  }
 0x2fa   : > { %901 = vset.pattern.permute.xlu1 %v1101_v44  ;;  %903 = vset.pattern.permute.xlu0 %v1101_v44 }
 0x2fb   : > { %539 = vperm.xlu1 %901, %v1219_v33  }
 0x348   : > { %v413_v52 = vpop.permute.xlu1 %412 }
 0x349   : > { %v418_v54 = vmul.f32 %v416_v47, %v413_v52  ;;  %v427_v59 = vmul.f32 %v425_v21, %v413_v52  ;;  %v436_v63 = vmul.f32 %v434_v58, %v413_v52 }
 0x34b   : > { %v420_v44 = vrot.slane %v418_v54, 1  ;;  %v429_v62 = vrot.slane %v427_v59, 2  ;;  %v438_v1 = vrot.slane %v436_v63, 3 }
 0x34d   : > { %v422_v60 = vsub.f32 %v1240_v57, %v420_v44 }
 0x34f   : > { %v431_v0 = vsub.f32 %v422_v60, %v429_v62 }
 0x351   : > { %v440_v3 = vsub.f32 %v431_v0, %v438_v1  ;;  %v468_v14 = vpop.permute.xlu1 %467 }
 0x352   : > { %v479_v17 = vmul.f32 %v477_v13, %v468_v14  ;;  %v488_v19 = vmul.f32 %v486_v15, %v468_v14 }
 0x353   : > { %v456_v56 = vadd.f32 1e-16, %v440_v3 }
 0x354   : > { %v481_v23 = vrot.slane %v479_v17, 1  ;;  %v490_v25 = vrot.slane %v488_v19, 2  ;;  %v568_v17 = vpop.permute.xlu2 %567 }
 0x35b   : > { %v460_v4 = vpop.permute.xlu0 %459  ;;  %v496_v29 = vpop.permute.xlu1 %495 }
 0x35c   : > { %v462_v5 = vmul.f32 %v460_v4, %v456_v56 }
 0x35e   : > { %v819_v6 = vcvt.f32.s32 %v462_v5  ;;  %v817_v2 = vand.u32 2147483647, %v462_v5  ;;  %v822_v50 = vand.u32 2147483648, %v462_v5 }
 0x360   : > { %v820_v7 = vcvt.s32.f32 %v819_v6  ;;  %vm818_vm8 = vcmp.lt.f32.partialorder %v817_v2, 8388608.0 }
 0x362   : > { %v821_v8 = vand.u32 2147483647, %v820_v7 }
 0x364   : > { %v823_v9 = vor.u32 %v822_v50, %v821_v8  ;;  %v504_v40 = vpop.permute.xlu0 %503  ;;  %v532_v44 = vpop.permute.xlu1 %531 }
 0x365   : > { %v524_v48 = vmul.f32 %v522_v42, %v504_v40 }
 0x366   : > { %v824_v10 = vsel %vm818_vm8, %v823_v9, %v462_v5 }
 0x367   : > { %464 = vst.msk [vmem:[#allocation4] sm:$0x1] %vm246_vm10, %v824_v10  ;;  %v526_v53 = vrot.slane %v524_v48, 1 }
 0x36d   : > { %v540_v4 = vpop.permute.xlu1 %539 }
 0x36e   : > { %v465_v16 = vld [vmem:[#allocation4] sm:$0x1] }
 0x36f   : > { %v470_v18 = vmul.f32 %v468_v14, %v465_v16  ;;  %v501_v38 = vld [vmem:[#allocation4] sm:$0x1] }
 0x370   : > { %v506_v41 = vmul.f32 %v504_v40, %v501_v38  ;;  %v537_v5 = vld [vmem:[#allocation4] sm:$0x1] }
 0x371   : > { %v472_v22 = vrot.slane %v470_v18, 7  ;;  %v542_v7 = vmul.f32 %v540_v4, %v537_v5 }
 0x372   : > { %v508_v45 = vrot.slane %v506_v41, 6 }
 0x373   : > { %v474_v24 = vsub.f32 %v1240_v57, %v472_v22  ;;  %v544_v8 = vrot.slane %v542_v7, 5 }
 0x374   : > { %v510_v51 = vsub.f32 %v1240_v57, %v508_v45 }
 0x375   : > { %v483_v26 = vsub.f32 %v474_v24, %v481_v23  ;;  %v546_v11 = vsub.f32 %v1240_v57, %v544_v8 }
 0x377   : > { %v492_v27 = vsub.f32 %v483_v26, %v490_v25 }
 0x379   : > { %v493_v28 = vadd.f32 1e-16, %v492_v27 }
 0x37b   : > { %v498_v30 = vmul.f32 %v496_v29, %v493_v28 }
 0x37d   : > { %v827_v31 = vcvt.f32.s32 %v498_v30  ;;  %v825_v61 = vand.u32 2147483647, %v498_v30  ;;  %v830_v35 = vand.u32 2147483648, %v498_v30 }
 0x37f   : > { %v828_v32 = vcvt.s32.f32 %v827_v31  ;;  %vm826_vm9 = vcmp.lt.f32.partialorder %v825_v61, 8388608.0 }
 0x381   : > { %v829_v34 = vand.u32 2147483647, %v828_v32 }
 0x383   : > { %v831_v36 = vor.u32 %v830_v35, %v829_v34 }
 0x385   : > { %v832_v37 = vsel %vm826_vm9, %v831_v36, %v498_v30 }
 0x386   : > { %500 = vst.msk [vmem:[#allocation4] sm:$0x2] %vm283_vm12, %v832_v37  ;;  %vm601_vm12 = vcmask 3072  }
 0x38d   : > { %v511_v43 = vld [vmem:[#allocation4 + $0x1] sm:$0x1] }
 0x38e   : > { %v513_v20 = vrot.slane %v511_v43, 7  ;;  %v547_v3 = vld [vmem:[#allocation4 + $0x1] sm:$0x1] }
 0x38f   : > { %v549_v6 = vrot.slane %v547_v3, 7 }
 0x390   : > { %v515_v47 = vmul.f32 %v513_v20, %v504_v40 }
 0x391   : > { %v551_v2 = vmul.f32 %v549_v6, %v540_v4 }
 0x392   : > { %v517_v21 = vrot.slane %v515_v47, 7 }
 0x393   : > { %v553_v9 = vrot.slane %v551_v2, 6 }
 0x394   : > { %v519_v52 = vsub.f32 %v510_v51, %v517_v21 }
 0x395   : > { %v555_v13 = vsub.f32 %v546_v11, %v553_v9 }
 0x396   : > { %v528_v54 = vsub.f32 %v519_v52, %v526_v53 }
 0x398   : > { %v529_v55 = vadd.f32 1e-16, %v528_v54 }
 0x39a   : > { %v534_v58 = vmul.f32 %v532_v44, %v529_v55 }
 0x39c   : > { %v835_v59 = vcvt.f32.s32 %v534_v58  ;;  %v833_v62 = vand.u32 2147483647, %v534_v58  ;;  %v838_v0 = vand.u32 2147483648, %v534_v58 }
 0x39e   : > { %v836_v60 = vcvt.s32.f32 %v835_v59  ;;  %vm834_vm10 = vcmp.lt.f32.partialorder %v833_v62, 8388608.0 }
 0x3a0   : > { %v837_v63 = vand.u32 2147483647, %v836_v60 }
 0x3a2   : > { %v839_v1 = vor.u32 %v838_v0, %v837_v63 }
 0x3a4   : > { %v840_v56 = vsel %vm834_vm10, %v839_v1, %v534_v58 }
 0x3a5   : > { %536 = vst.msk [vmem:[#allocation4] sm:$0x4] %vm320_vm14, %v840_v56 }
 0x3ac   : > { %v556_v50 = vld [vmem:[#allocation4 + $0x2] sm:$0x1] }
 0x3ad   : > { %v558_v10 = vrot.slane %v556_v50, 6 }
 0x3af   : > { %v560_v12 = vmul.f32 %v558_v10, %v540_v4 }
 0x3b1   : > { %v562_v14 = vrot.slane %v560_v12, 7 }
 0x3b3   : > { %v564_v15 = vsub.f32 %v555_v13, %v562_v14 }
 0x3b5   : > { %v565_v16 = vadd.f32 1e-16, %v564_v15 }
 0x3b7   : > { %v570_v18 = vmul.f32 %v568_v17, %v565_v16 }
 0x3b9   : > { %v843_v19 = vcvt.f32.s32 %v570_v18  ;;  %v841_v23 = vand.u32 2147483647, %v570_v18  ;;  %v846_v25 = vand.u32 2147483648, %v570_v18 }
 0x3bb   : > { %v844_v22 = vcvt.s32.f32 %v843_v19  ;;  %vm842_vm11 = vcmp.lt.f32.partialorder %v841_v23, 8388608.0 }
 0x3bd   : > { %v845_v24 = vand.u32 2147483647, %v844_v22 }
 0x3bf   : > { %v847_v26 = vor.u32 %v846_v25, %v845_v24 }
 0x3c1   : > { %v848_v27 = vsel %vm842_vm11, %v847_v26, %v570_v18 }
 0x3c2   : > { %572 = vst.msk [vmem:[#allocation4] sm:$0x8] %vm357_vm2, %v848_v27 }
 0x3c9   : > { %v573_v28 = vld [vmem:[#allocation4] sm:$0xf] }
 0x3ca   : > { %776 = vmatpush.xpose.msk.msra.mxu3 %vm79_vm0, %v573_v28  ;;  %v574_v57 = vsel %vm103_vm1, %v573_v28, 0.0  ;;  %v624_v29 = vmul.f32 %v573_v28, %v1231_v46 }
 0x3cb   : > { %575 = vadd.xlane.f32.xlu0 %v574_v57 }
 0x3cc   : > { %v625_v30 = vsel %vm103_vm1, %v624_v29, 0.0 }
 0x3cd   : > { %777 = vmatmul.msk.f32.vlgmr.msra.gmra.mxu3 %vm79_vm0, %v573_v28 }
 0x3d3   : > { %626 = vadd.xlane.f32.xlu0 %v625_v30 }
 0x43e   : > { %v1255_v2 = vpop.xlane.xlu0 %575  }
 0x43f   : > { %v600_v31 = vmul.f32 %v1255_v2, %v1233_v49 }
 0x441   : > { %v602_v32 = vsel %vm601_vm12, %v600_v31, 0.0 }
 0x442   : > { %603 = vadd.xlane.f32.xlu1 %v602_v32 }
 0x446   : > { %v627_v38 = vpop.xlane.xlu0 %626 }
 0x447   : > { %v628_v41 = vrot.slane %v627_v38, 4 }
 0x449   : > { %v629_v49 = vadd.f32 %v628_v41, %v627_v38 }
 0x44b   : > { %v630_v43 = vrot.slane %v629_v49, 2 }
 0x44d   : > { %v631_v48 = vadd.f32 %v630_v43, %v629_v49 }
 0x44f   : > { %v632_v21 = vrot.slane %v631_v48, 1 }
 0x450   : > { %v1259_v3 = vpop.f32.mrf.mxu3  }
 0x451   : > { %v612_v61 = vmul.f32 %v1259_v3, %v1219_v33  ;;  %v633_v54 = vadd.f32 %v632_v21, %v631_v48 }
 0x453   : > { %v614_v34 = vsel %vm613_vm13, %v612_v61, 0.0 }
 0x454   : > { %615 = vadd.xlane.f32.xlu2 %v614_v34 }
 0x4b5   : > { %v604_v46 = vpop.xlane.xlu1 %603 }
 0x4b6   : > { %v605_v35 = vrot.slane %v604_v46, 4 }
 0x4b8   : > { %v606_v36 = vadd.f32 %v605_v35, %v604_v46 }
 0x4ba   : > { %v607_v37 = vrot.slane %v606_v36, 2 }
 0x4bc   : > { %v608_v39 = vadd.f32 %v607_v37, %v606_v36 }
 0x4be   : > { %v609_v40 = vrot.slane %v608_v39, 1 }
 0x4c0   : > { %v610_v42 = vadd.f32 %v609_v40, %v608_v39 }
 0x4c2   : > { %849 = vpush %v610_v42 }
 0x4c7   : > { %v616_v45 = vpop.xlane.xlu2 %615 }
 0x4c8   : > { %v617_v20 = vrot.slane %v616_v45, 4 }
 0x4ca   : > { %v618_v47 = vadd.f32 %v617_v20, %v616_v45 }
 0x4cc   : > { %v619_v33 = vrot.slane %v618_v47, 2 }
 0x4ce   : > { %v620_v51 = vadd.f32 %v619_v33, %v618_v47 }
 0x4d0   : > { %v621_v52 = vrot.slane %v620_v51, 1 }
 0x4d2   : > { %v622_v53 = vadd.f32 %v621_v52, %v620_v51 }
 0x4d4   : > { %851 = vpush %v622_v53 }
 0x4d5   : > { %853 = vpush %v633_v54 }
 0x4f3   : > { %s1263_s21 = spop %849 }
 0x4f4   : > { %s636_s22 = smul.f32 %s1263_s21, %s1263_s21 }
 0x4f5   : > { %s666_s13 = smul.f32 %s1263_s21, %s1166_s2 }
 0x505   : > { %s852_s23 = spop %851 }
 0x506   : > { %s635_s24 = smul.f32 256.0, %s852_s23  ;;  %s1267_s25 = spop %853 }
 0x507   : > { %s645_s26 = smul.f32 %s852_s23, %s1166_s2 }
 0x508   : > { %s637_s27 = ssub.f32 %s635_s24, %s636_s22  ;;  %s638_s28 = sand.u32 2147483647, %s635_s24 }
 0x509   : > { %s639_s29 = smax.f32 %s638_s28, %s636_s22  ;;  %s646_s30 = smul.f32 %s1267_s25, %s1263_s21 }
 0x50a   : > { %s641_s8 = smax.f32 %s1102_s7, %s639_s29  ;;  %s640_s11 = sand.u32 2147483647, %s637_s27 }
 0x50b   : > { %s642_s3 = smul.f32 1e-12, %s641_s8  ;;  %s647_s10 = ssub.f32 %s645_s26, %s646_s30 }
 0x50c   : > { %s665_s0 = smul.f32 256.0, %s1267_s25  ;;  %s711_s24 = sshll.u32 (%p128_p1), %s1314_s5, 4  ;;  %s712_s24 = int_to_ptr.hbm [resolvable:$true] %s711_s24 }
 0x50d   : > { %p1272_p0 = scmp.gt.f32.partialorder %s640_s11, %s642_s3 }
 0x50e   : > { %s667_s17 = ssub.f32 %s665_s0, %s666_s13 }
 0x50f   : > { %s1318_s27 = smov (!%p1272_p0, %s637_s27), 1.0 }
 0x510   : > { %v648_v55 = vstv %s1318_s27 }
 0x511   : > { %910 = vrcp.f32 %v648_v55  ;;  %v660_v60 = vand.u32 2147483648, %v648_v55  ;;  %v658_v63 = vand.u32 2147483647, %v648_v55  ;;  %vm654_vm15 = vweird.f32 %v648_v55 }
 0x513   : > { %v661_v1 = vor.u32 1.1754944e-38, %v660_v60  ;;  %vm659_vm3 = vcmp.eq.f32.partialorder %v658_v63, 8.507059e+37 }
 0x517   : > { %v911_v44 = vpop.eup %910 }
 0x518   : > { %v650_v58 = vmul.f32 %v911_v44, %v648_v55  ;;  %vm655_vm14 = vweird.f32 %v911_v44 }
 0x519   : > { %vm656_vm2 = vmor %vm654_vm15, %vm655_vm14 }
 0x51a   : > { %v651_v59 = vsub.f32 1.0, %v650_v58 }
 0x51c   : > { %v652_v62 = vmul.f32 %v911_v44, %v651_v59 }
 0x51e   : > { %v653_v0 = vadd.f32 %v911_v44, %v652_v62 }
 0x520   : > { %v657_v56 = vsel %vm656_vm2, %v911_v44, %v653_v0 }
 0x521   : > { %v662_v4 = vsel %vm659_vm3, %v661_v1, %v657_v56 }
 0x522   : > { %855 = vpush %v662_v4 }
 0x553   : > { %s856_s1 = spop %855 }
 0x554   : > { %s664_s19 = smul.f32 %s856_s1, %s647_s10 }
 0x555   : > { %s684_s20 = smul.f32 %s856_s1, %s667_s17 }
 0x556   : > { %s1320_s19 = smov (!%p1272_p0, %s664_s19), %s1192_s18  ;;  %130 = sbr.rel (!%p128_p1) target bundleno = 335 (0x14f), region = 61 }
 0x557   : > { %s1322_s20 = smov (!%p1272_p0, %s684_s20), %s1182_s16  ;;  %686 = sst [smem:[#allocation9]] %s1320_s19 }
 0x558   : > { %688 = sst [smem:[#allocation9 + $0x1]] %s1322_s20  ;;  %s698_s16 = sshll.u32 (%p128_p1), %s1313_s4, 4  ;;  %s699_s16 = int_to_ptr.hbm [resolvable:$true] %s698_s16 }
 0x559   :  { %701 = dma.vmem_to_hbm [thread:$0]  (%p128_p1), %s52_s9, 64, %s699_s16, [#allocation5] }
 0x55a   :  { %714 = dma.vmem_to_hbm [thread:$0]  (%p128_p1), %s66_s14, 64, %s712_s24, [#allocation5 + $0x1] }
 0x55b   :  { %1076 = dma.done.wait [#allocation5], 64 }
 0x55c   :  { %1077 = vsyncadd [#allocation5], 4294967232 }
 0x55d   :  { %1078 = dma.done.wait [#allocation5 + $0x1], 64 }
 0x55e   :  { %1079 = vsyncadd [#allocation5 + $0x1], 4294967232  ;;  %s724_s25 = sshll.u32 %s1315_s6, 4  ;;  %s1103_s4 = smov [#allocation9]   ;;  %s725_s25 = int_to_ptr.hbm [resolvable:$true] %s724_s25 }
 0x55f   :  { %727 = dma.smem_to_hbm %s1103_s4, 16, %s725_s25, [#allocation7]  }
 0x560   :  { %1080 = dma.done.wait [#allocation7], 16  }
 0x561   :  { %1081 = vsyncadd [#allocation7], 4294967280 }
 0x562   :  { %732 = sfence }
 0x563   :  { %733 = vsyncpa [#allocation7], 1 }
 0x564   :  { %734 = vsyncpa [#allocation8], 1 }
 0x565   :  { %735 = vsyncmov [#allocation5] }
 0x568   :  { %s736_s5 = vpop.sfrf %735 }
 0x569   :  { %p778_p2 = scmp.ne.s32.totalorder %s736_s5, 0 }
 0x56b   :  { %740 = shalt.err (%p778_p2)  }
 0x56c   :  { %742 = vsyncmov [#allocation5 + $0x1] }
 0x56f   :  { %s743_s9 = vpop.sfrf %742 }
 0x570   :  { %p779_p3 = scmp.ne.s32.totalorder %s743_s9, 0 }
 0x572   :  { %747 = shalt.err (%p779_p3)  }
 0x573   :  { %749 = vsyncmov [#allocation5 + $0x2] }
 0x576   :  { %s750_s14 = vpop.sfrf %749 }
 0x577   :  { %p780_p4 = scmp.ne.s32.totalorder %s750_s14, 0 }
 0x579   :  { %754 = shalt.err (%p780_p4)  }

</bundles_post_ra>
